<compile_context>
chip_gen: v6e
topology: v6e:2x2x1
jax: 0.10.0
libtpu: 0.0.40
codegen_flags: <defaults>
</compile_context>

<pallas_src>
import jax
import jax.numpy as jnp
from jax import lax
from jax.experimental import pallas as pl
from jax.experimental.pallas import tpu as pltpu

# ----------------- small synthetic config -----------------
B, S, H, F, L, V = 2, 8, 128, 512, 2, 30     # batch, seq, hidden, ffn, layers, vocab
N1, N2, N3, N4 = 3, 15, 22, 13               # num_labels_level1..4 (from __init__)
N_TOTAL = N1 + N2 + N3 + N4                  # 53
HEAD_PAD = 128                               # lane-dense padded head output width
LN_EPS = 1e-12
ATT_SCALE = float(H) ** -0.5                 # single attention head (d_head = H)
B_BLK = max(1, B // 2)                       # nb >= 2 so v7x megacore gets both cores
NB = B // B_BLK

STACK_KEYS = ("wqkv", "bqkv", "wo", "bo", "g1", "be1",
              "w1", "b1", "w2", "b2", "g2", "be2")


# ----------------- Pallas kernel -----------------
def _layernorm(y, g, b):
    mu = jnp.mean(y, axis=-1, keepdims=True)
    var = jnp.mean(jnp.square(y - mu), axis=-1, keepdims=True)
    return (y - mu) * lax.rsqrt(var + LN_EPS) * g + b


def fused_kernel(x_ref, mask_ref,
                 wqkv_ref, bqkv_ref, wo_ref, bo_ref, g1_ref, be1_ref,
                 w1_ref, b1_ref, w2_ref, b2_ref, g2_ref, be2_ref,
                 wh_ref, bh_ref,
                 logits_ref):
    # grid = (batch_blocks,); all L layers run in an in-kernel loop, the hidden
    # state never leaves VMEM.
    x = x_ref[...]                         # (Bb, S, H) f32 embeddings
    m = mask_ref[...]                      # (Bb, 1, S) f32 additive mask (0 / -1e9)
    bsz, seq, hid = x.shape

    def layer_body(l, x):
        x2 = x.reshape(bsz * seq, hid)                                   # (Bb*S, H) f32

        # --- self attention (single head), packed QKV projection (bf16 MXU) ---
        qkv = jnp.dot(x2.astype(jnp.bfloat16), wqkv_ref[l],
                      preferred_element_type=jnp.float32) + bqkv_ref[l]  # (Bb*S, 3H) f32
        qkv = qkv.reshape(bsz, seq, 3 * hid)
        q = qkv[:, :, 0 * hid:1 * hid]     # 128-aligned lane slices (H = 128)
        k = qkv[:, :, 1 * hid:2 * hid]
        v = qkv[:, :, 2 * hid:3 * hid]

        s = jnp.einsum("bqd,bkd->bqk",
                       q.astype(jnp.bfloat16), k.astype(jnp.bfloat16),
                       preferred_element_type=jnp.float32) * ATT_SCALE
        s = s + m                          # (Bb,1,S) broadcasts over query axis
        s = s - jnp.max(s, axis=-1, keepdims=True)
        p = jnp.exp(s)
        p = p * pl.reciprocal(jnp.sum(p, axis=-1, keepdims=True), approx=True)

        ctx = jnp.einsum("bqk,bkd->bqd",
                         p.astype(jnp.bfloat16), v.astype(jnp.bfloat16),
                         preferred_element_type=jnp.float32)             # (Bb,S,H) f32
        attn = jnp.dot(ctx.reshape(bsz * seq, hid).astype(jnp.bfloat16), wo_ref[l],
                       preferred_element_type=jnp.float32) + bo_ref[l]
        h = _layernorm(x2 + attn, g1_ref[l], be1_ref[l])                  # (Bb*S, H) f32

        # --- feed-forward (gelu, tanh approximation), bf16 matmuls, f32 math ---
        ff = jnp.dot(h.astype(jnp.bfloat16), w1_ref[l],
                     preferred_element_type=jnp.float32) + b1_ref[l]      # (Bb*S, F) f32
        ff = 0.5 * ff * (1.0 + jnp.tanh(0.7978845608028654 *
                                        (ff + 0.044715 * ff * ff * ff)))
        ff = jnp.dot(ff.astype(jnp.bfloat16), w2_ref[l],
                     preferred_element_type=jnp.float32) + b2_ref[l]      # (Bb*S, H) f32

        y2 = _layernorm(h + ff, g2_ref[l], be2_ref[l])
        return y2.reshape(bsz, seq, hid)

    x = lax.fori_loop(0, L, layer_body, x, unroll=True)

    # --- CLS pooling + fused 4-head projection (lane-padded to 128) ---
    # nn.Dropout(0.1) is the identity at inference time (eval mode).
    # TODO(synk): training-mode dropout masking not implemented.
    cls = x[:, 0, :]                                                      # (Bb, H)
    logits = jnp.dot(cls.astype(jnp.bfloat16), wh_ref[...],
                     preferred_element_type=jnp.float32) + bh_ref[...]    # (Bb, 128)
    logits_ref[...] = logits.reshape(bsz, 1, HEAD_PAD)


# ----------------- wrapper -----------------
def fused_forward(x, addmask, params):
    lp = params["layers"]
    hp = params["heads"]
    b_total = x.shape[0]
    nb = b_total // B_BLK

    def full_spec(arr):
        nd = arr.ndim
        return pl.BlockSpec(arr.shape, lambda b, _nd=nd: (0,) * _nd)     # whole array, VMEM-resident

    in_specs = (
        [pl.BlockSpec((B_BLK, S, H), lambda b: (b, 0, 0)),   # embeddings
         pl.BlockSpec((B_BLK, 1, S), lambda b: (b, 0, 0))]   # additive mask
        + [full_spec(lp[k]) for k in STACK_KEYS]             # stacked (L, ...) weights
        + [full_spec(hp["w_all"]), full_spec(hp["b_all"])]   # fused head weights
    )

    return pl.pallas_call(
        fused_kernel,
        grid=(nb,),
        in_specs=in_specs,
        out_specs=pl.BlockSpec((B_BLK, 1, HEAD_PAD), lambda b: (b, 0, 0)),
        out_shape=jax.ShapeDtypeStruct((b_total, 1, HEAD_PAD), jnp.float32),
        compiler_params=pltpu.CompilerParams(
            dimension_semantics=("parallel",),
            vmem_limit_bytes=32 * 1024 * 1024),
    )(x, addmask, *[lp[k] for k in STACK_KEYS], hp["w_all"], hp["b_all"])


def hierarchical_classifier_forward(input_ids, attention_mask, params):
    # --- embeddings (glue: gather + embedding layernorm in plain JAX) ---
    x = params["tok_emb"][input_ids] + params["pos_emb"][None, :, :]
    mu = x.mean(-1, keepdims=True)
    var = ((x - mu) ** 2).mean(-1, keepdims=True)
    x = (x - mu) / jnp.sqrt(var + LN_EPS) * params["emb_g"] + params["emb_b"]

    # BERT-style extended attention mask: 0 where attended, -1e9 where padded.
    addmask = ((1.0 - attention_mask.astype(jnp.float32)) * -1e9)[:, None, :]   # (B,1,S)

    padded_logits = fused_forward(x, addmask, params)[:, 0, :]                  # (B, 128)

    c1, c2, c3 = N1, N1 + N2, N1 + N2 + N3
    return (padded_logits[:, :c1],
            padded_logits[:, c1:c2],
            padded_logits[:, c2:c3],
            padded_logits[:, c3:N_TOTAL])


# ----------------- deterministic parameter init -----------------
def init_params(key):
    keys = jax.random.split(key, 16)
    kit = iter(keys)

    def nrm(shape, dtype=jnp.float32):
        return (0.02 * jax.random.normal(next(kit), shape, jnp.float32)).astype(dtype)

    bf = jnp.bfloat16
    params = {
        "tok_emb": nrm((V, H)),
        "pos_emb": nrm((S, H)),
        "emb_g": jnp.ones((H,), jnp.float32),
        "emb_b": jnp.zeros((H,), jnp.float32),
    }
    # Per-layer weights stacked along a leading L axis; matmul weights in bf16,
    # biases / LN params in f32; Q/K/V packed into one (H, 3H) weight.
    params["layers"] = {
        "wqkv": nrm((L, H, 3 * H), bf), "bqkv": jnp.zeros((L, 1, 3 * H), jnp.float32),
        "wo":   nrm((L, H, H), bf),     "bo":   jnp.zeros((L, 1, H), jnp.float32),
        "g1":   jnp.ones((L, 1, H), jnp.float32), "be1": jnp.zeros((L, 1, H), jnp.float32),
        "w1":   nrm((L, H, F), bf),     "b1":   jnp.zeros((L, 1, F), jnp.float32),
        "w2":   nrm((L, F, H), bf),     "b2":   jnp.zeros((L, 1, H), jnp.float32),
        "g2":   jnp.ones((L, 1, H), jnp.float32), "be2": jnp.zeros((L, 1, H), jnp.float32),
    }
    # Four heads fused into one (H, 128) lane-padded bf16 weight; columns >= N_TOTAL
    # are zero and get trimmed away in the wrapper.
    w_heads = nrm((H, N_TOTAL))
    params["heads"] = {
        "w_all": jnp.zeros((H, HEAD_PAD), jnp.float32).at[:, :N_TOTAL].set(w_heads).astype(bf),
        "b_all": jnp.zeros((1, HEAD_PAD), jnp.float32),
    }
    return params


# ----------------- main -----------------
if __name__ == "__main__":
    root = jax.random.PRNGKey(0)
    k_par, k_ids = jax.random.split(root)

    params = init_params(k_par)
    input_ids = jax.random.randint(k_ids, (B, S), 0, V, dtype=jnp.int32)
    attention_mask = jnp.ones((B, S), jnp.int32).at[1, 6:].set(0)  # pad tail of sample 1

    logits = hierarchical_classifier_forward(input_ids, attention_mask, params)
    logits = jax.block_until_ready(logits)

    assert logits[0].shape == (B, N1)
    assert logits[1].shape == (B, N2)
    assert logits[2].shape == (B, N3)
    assert logits[3].shape == (B, N4)
    assert all(bool(jnp.all(jnp.isfinite(l))) for l in logits)
    print("KERNEL_OK")
</pallas_src>

<mosaic_0001>
module attributes {stable_mosaic.version = 11 : i64} {
  func.func @fused_kernel(%arg0: i32, %arg1: memref<1x8x128xf32, #tpu.memory_space<vmem>>, %arg2: memref<1x1x8xf32, #tpu.memory_space<vmem>>, %arg3: memref<2x128x384xbf16, #tpu.memory_space<vmem>>, %arg4: memref<2x1x384xf32, #tpu.memory_space<vmem>>, %arg5: memref<2x128x128xbf16, #tpu.memory_space<vmem>>, %arg6: memref<2x1x128xf32, #tpu.memory_space<vmem>>, %arg7: memref<2x1x128xf32, #tpu.memory_space<vmem>>, %arg8: memref<2x1x128xf32, #tpu.memory_space<vmem>>, %arg9: memref<2x128x512xbf16, #tpu.memory_space<vmem>>, %arg10: memref<2x1x512xf32, #tpu.memory_space<vmem>>, %arg11: memref<2x512x128xbf16, #tpu.memory_space<vmem>>, %arg12: memref<2x1x128xf32, #tpu.memory_space<vmem>>, %arg13: memref<2x1x128xf32, #tpu.memory_space<vmem>>, %arg14: memref<2x1x128xf32, #tpu.memory_space<vmem>>, %arg15: memref<128x128xbf16, #tpu.memory_space<vmem>>, %arg16: memref<1x128xf32, #tpu.memory_space<vmem>>, %arg17: memref<1x1x128xf32, #tpu.memory_space<vmem>>) attributes {dimension_semantics = [#tpu.dimension_semantics<parallel>], iteration_bounds = array<i64: 2>, scalar_prefetch = 0 : i64, scratch_operands = 0 : i64, tpu.core_type = #tpu.core_type<tc>, window_params = [{transform_indices = @transform_0, window_bounds = array<i64: 1, 8, 128>}, {transform_indices = @transform_1, window_bounds = array<i64: 1, 1, 8>}, {pipeline_mode = #tpu.pipeline_mode<synchronous>, transform_indices = @transform_2, window_bounds = array<i64: 2, 128, 384>}, {pipeline_mode = #tpu.pipeline_mode<synchronous>, transform_indices = @transform_3, window_bounds = array<i64: 2, 1, 384>}, {pipeline_mode = #tpu.pipeline_mode<synchronous>, transform_indices = @transform_4, window_bounds = array<i64: 2, 128, 128>}, {pipeline_mode = #tpu.pipeline_mode<synchronous>, transform_indices = @transform_5, window_bounds = array<i64: 2, 1, 128>}, {pipeline_mode = #tpu.pipeline_mode<synchronous>, transform_indices = @transform_6, window_bounds = array<i64: 2, 1, 128>}, {pipeline_mode = #tpu.pipeline_mode<synchronous>, transform_indices = @transform_7, window_bounds = array<i64: 2, 1, 128>}, {pipeline_mode = #tpu.pipeline_mode<synchronous>, transform_indices = @transform_8, window_bounds = array<i64: 2, 128, 512>}, {pipeline_mode = #tpu.pipeline_mode<synchronous>, transform_indices = @transform_9, window_bounds = array<i64: 2, 1, 512>}, {pipeline_mode = #tpu.pipeline_mode<synchronous>, transform_indices = @transform_10, window_bounds = array<i64: 2, 512, 128>}, {pipeline_mode = #tpu.pipeline_mode<synchronous>, transform_indices = @transform_11, window_bounds = array<i64: 2, 1, 128>}, {pipeline_mode = #tpu.pipeline_mode<synchronous>, transform_indices = @transform_12, window_bounds = array<i64: 2, 1, 128>}, {pipeline_mode = #tpu.pipeline_mode<synchronous>, transform_indices = @transform_13, window_bounds = array<i64: 2, 1, 128>}, {pipeline_mode = #tpu.pipeline_mode<synchronous>, transform_indices = @transform_14, window_bounds = array<i64: 128, 128>}, {pipeline_mode = #tpu.pipeline_mode<synchronous>, transform_indices = @transform_15, window_bounds = array<i64: 1, 128>}, {transform_indices = @transform_16, window_bounds = array<i64: 1, 1, 128>}]} {
    %c0 = arith.constant 0 : index
    %c0_0 = arith.constant 0 : index
    %c0_1 = arith.constant 0 : index
    %0 = vector.load %arg1[%c0, %c0_0, %c0_1] : memref<1x8x128xf32, #tpu.memory_space<vmem>>, vector<1x8x128xf32>
    %c0_2 = arith.constant 0 : index
    %c0_3 = arith.constant 0 : index
    %c0_4 = arith.constant 0 : index
    %1 = vector.load %arg2[%c0_2, %c0_3, %c0_4] : memref<1x1x8xf32, #tpu.memory_space<vmem>>, vector<1x1x8xf32>
    %c0_i32 = arith.constant 0 : i32
    %2 = vector.shape_cast %0 : vector<1x8x128xf32> to vector<8x128xf32>
    %3 = arith.truncf %2 : vector<8x128xf32> to vector<8x128xbf16>
    %4 = arith.index_cast %c0_i32 : i32 to index
    %c0_5 = arith.constant 0 : index
    %c0_6 = arith.constant 0 : index
    %5 = vector.load %arg3[%4, %c0_5, %c0_6] : memref<2x128x384xbf16, #tpu.memory_space<vmem>>, vector<1x128x384xbf16>
    %6 = vector.shape_cast %5 : vector<1x128x384xbf16> to vector<128x384xbf16>
    %cst = arith.constant dense<0.000000e+00> : vector<8x384xf32>
    %7 = tpu.matmul %3, %6, %cst {dimension_numbers = #tpu.dot_dimension_numbers<[1], [0], [0], [1], [0, 0, 1, 1], [], []>} : vector<8x128xbf16>, vector<128x384xbf16>, vector<8x384xf32> -> vector<8x384xf32>
    %8 = arith.index_cast %c0_i32 : i32 to index
    %c0_7 = arith.constant 0 : index
    %c0_8 = arith.constant 0 : index
    %9 = vector.load %arg4[%8, %c0_7, %c0_8] : memref<2x1x384xf32, #tpu.memory_space<vmem>>, vector<1x1x384xf32>
    %10 = vector.shape_cast %9 : vector<1x1x384xf32> to vector<1x384xf32>
    %11 = vector.broadcast %10 : vector<1x384xf32> to vector<8x384xf32>
    %12 = arith.addf %7, %11 : vector<8x384xf32>
    %13 = vector.shape_cast %12 : vector<8x384xf32> to vector<1x8x384xf32>
    %14 = vector.extract_strided_slice %13 {offsets = [0, 0, 0], sizes = [1, 8, 128], strides = [1, 1, 1]} : vector<1x8x384xf32> to vector<1x8x128xf32>
    %15 = vector.extract_strided_slice %13 {offsets = [0, 0, 128], sizes = [1, 8, 128], strides = [1, 1, 1]} : vector<1x8x384xf32> to vector<1x8x128xf32>
    %16 = vector.extract_strided_slice %13 {offsets = [0, 0, 256], sizes = [1, 8, 128], strides = [1, 1, 1]} : vector<1x8x384xf32> to vector<1x8x128xf32>
    %17 = arith.truncf %14 : vector<1x8x128xf32> to vector<1x8x128xbf16>
    %18 = arith.truncf %15 : vector<1x8x128xf32> to vector<1x8x128xbf16>
    "tpu.trace_start"() <{level = 10 : i32, message = "bqd,bkd->bqk"}> : () -> ()
    %cst_9 = arith.constant dense<0.000000e+00> : vector<1x8x8xf32>
    %19 = tpu.matmul %17, %18, %cst_9 {dimension_numbers = #tpu.dot_dimension_numbers<[2], [2], [1], [1], [0, 0, 0, 1, 1, 1], [0], [0]>} : vector<1x8x128xbf16>, vector<1x8x128xbf16>, vector<1x8x8xf32> -> vector<1x8x8xf32>
    "tpu.trace_stop"() : () -> ()
    %cst_10 = arith.constant 0.0883883461 : f32
    %20 = vector.broadcast %cst_10 : f32 to vector<1x8x8xf32>
    %21 = arith.mulf %19, %20 : vector<1x8x8xf32>
    %22 = vector.broadcast %1 : vector<1x1x8xf32> to vector<1x8x8xf32>
    %23 = arith.addf %21, %22 : vector<1x8x8xf32>
    %cst_11 = arith.constant dense<0xFF800000> : vector<1x8xf32>
    %24 = vector.multi_reduction <maximumf>, %23, %cst_11 [2] : vector<1x8x8xf32> to vector<1x8xf32>
    %25 = vector.shape_cast %24 : vector<1x8xf32> to vector<1x8x1xf32>
    %26 = vector.broadcast %25 : vector<1x8x1xf32> to vector<1x8x8xf32>
    %27 = arith.subf %23, %26 : vector<1x8x8xf32>
    %28 = math.exp %27 : vector<1x8x8xf32>
    %cst_12 = arith.constant dense<0.000000e+00> : vector<1x8xf32>
    %29 = vector.multi_reduction <add>, %28, %cst_12 [2] : vector<1x8x8xf32> to vector<1x8xf32>
    %30 = vector.shape_cast %29 : vector<1x8xf32> to vector<1x8x1xf32>
    %31 = tpu.reciprocal %30 {approx = true} : vector<1x8x1xf32> -> vector<1x8x1xf32>
    %32 = vector.broadcast %31 : vector<1x8x1xf32> to vector<1x8x8xf32>
    %33 = arith.mulf %28, %32 : vector<1x8x8xf32>
    %34 = arith.truncf %33 : vector<1x8x8xf32> to vector<1x8x8xbf16>
    %35 = arith.truncf %16 : vector<1x8x128xf32> to vector<1x8x128xbf16>
    "tpu.trace_start"() <{level = 10 : i32, message = "bqk,bkd->bqd"}> : () -> ()
    %cst_13 = arith.constant dense<0.000000e+00> : vector<1x8x128xf32>
    %36 = tpu.matmul %34, %35, %cst_13 {dimension_numbers = #tpu.dot_dimension_numbers<[2], [1], [1], [2], [0, 0, 0, 1, 1, 2], [0], [0]>} : vector<1x8x8xbf16>, vector<1x8x128xbf16>, vector<1x8x128xf32> -> vector<1x8x128xf32>
    "tpu.trace_stop"() : () -> ()
    %37 = vector.shape_cast %36 : vector<1x8x128xf32> to vector<8x128xf32>
    %38 = arith.truncf %37 : vector<8x128xf32> to vector<8x128xbf16>
    %39 = arith.index_cast %c0_i32 : i32 to index
    %c0_14 = arith.constant 0 : index
    %c0_15 = arith.constant 0 : index
    %40 = vector.load %arg5[%39, %c0_14, %c0_15] : memref<2x128x128xbf16, #tpu.memory_space<vmem>>, vector<1x128x128xbf16>
    %41 = vector.shape_cast %40 : vector<1x128x128xbf16> to vector<128x128xbf16>
    %cst_16 = arith.constant dense<0.000000e+00> : vector<8x128xf32>
    %42 = tpu.matmul %38, %41, %cst_16 {dimension_numbers = #tpu.dot_dimension_numbers<[1], [0], [0], [1], [0, 0, 1, 1], [], []>} : vector<8x128xbf16>, vector<128x128xbf16>, vector<8x128xf32> -> vector<8x128xf32>
    %43 = arith.index_cast %c0_i32 : i32 to index
    %c0_17 = arith.constant 0 : index
    %c0_18 = arith.constant 0 : index
    %44 = vector.load %arg6[%43, %c0_17, %c0_18] : memref<2x1x128xf32, #tpu.memory_space<vmem>>, vector<1x1x128xf32>
    %45 = vector.shape_cast %44 : vector<1x1x128xf32> to vector<1x128xf32>
    %46 = vector.broadcast %45 : vector<1x128xf32> to vector<8x128xf32>
    %47 = arith.addf %42, %46 : vector<8x128xf32>
    %48 = arith.addf %2, %47 : vector<8x128xf32>
    %49 = arith.index_cast %c0_i32 : i32 to index
    %c0_19 = arith.constant 0 : index
    %c0_20 = arith.constant 0 : index
    %50 = vector.load %arg7[%49, %c0_19, %c0_20] : memref<2x1x128xf32, #tpu.memory_space<vmem>>, vector<1x1x128xf32>
    %51 = vector.shape_cast %50 : vector<1x1x128xf32> to vector<1x128xf32>
    %52 = arith.index_cast %c0_i32 : i32 to index
    %c0_21 = arith.constant 0 : index
    %c0_22 = arith.constant 0 : index
    %53 = vector.load %arg8[%52, %c0_21, %c0_22] : memref<2x1x128xf32, #tpu.memory_space<vmem>>, vector<1x1x128xf32>
    %54 = vector.shape_cast %53 : vector<1x1x128xf32> to vector<1x128xf32>
    %cst_23 = arith.constant dense<0.000000e+00> : vector<8xf32>
    %55 = vector.multi_reduction <add>, %48, %cst_23 [1] : vector<8x128xf32> to vector<8xf32>
    %56 = vector.shape_cast %55 : vector<8xf32> to vector<8x1xf32>
    %cst_24 = arith.constant 1.280000e+02 : f32
    %57 = vector.broadcast %cst_24 : f32 to vector<8x1xf32>
    %58 = arith.divf %56, %57 : vector<8x1xf32>
    %59 = vector.broadcast %58 : vector<8x1xf32> to vector<8x128xf32>
    %60 = arith.subf %48, %59 : vector<8x128xf32>
    %61 = arith.mulf %60, %60 : vector<8x128xf32>
    %cst_25 = arith.constant dense<0.000000e+00> : vector<8xf32>
    %62 = vector.multi_reduction <add>, %61, %cst_25 [1] : vector<8x128xf32> to vector<8xf32>
    %63 = vector.shape_cast %62 : vector<8xf32> to vector<8x1xf32>
    %cst_26 = arith.constant 1.280000e+02 : f32
    %64 = vector.broadcast %cst_26 : f32 to vector<8x1xf32>
    %65 = arith.divf %63, %64 : vector<8x1xf32>
    %66 = vector.broadcast %58 : vector<8x1xf32> to vector<8x128xf32>
    %67 = arith.subf %48, %66 : vector<8x128xf32>
    %cst_27 = arith.constant 9.99999996E-13 : f32
    %68 = vector.broadcast %cst_27 : f32 to vector<8x1xf32>
    %69 = arith.addf %65, %68 : vector<8x1xf32>
    %70 = math.rsqrt %69 : vector<8x1xf32>
    %71 = vector.broadcast %70 : vector<8x1xf32> to vector<8x128xf32>
    %72 = arith.mulf %67, %71 : vector<8x128xf32>
    %73 = vector.broadcast %51 : vector<1x128xf32> to vector<8x128xf32>
    %74 = arith.mulf %72, %73 : vector<8x128xf32>
    %75 = vector.broadcast %54 : vector<1x128xf32> to vector<8x128xf32>
    %76 = arith.addf %74, %75 : vector<8x128xf32>
    %77 = arith.truncf %76 : vector<8x128xf32> to vector<8x128xbf16>
    %78 = arith.index_cast %c0_i32 : i32 to index
    %c0_28 = arith.constant 0 : index
    %c0_29 = arith.constant 0 : index
    %79 = vector.load %arg9[%78, %c0_28, %c0_29] : memref<2x128x512xbf16, #tpu.memory_space<vmem>>, vector<1x128x512xbf16>
    %80 = vector.shape_cast %79 : vector<1x128x512xbf16> to vector<128x512xbf16>
    %cst_30 = arith.constant dense<0.000000e+00> : vector<8x512xf32>
    %81 = tpu.matmul %77, %80, %cst_30 {dimension_numbers = #tpu.dot_dimension_numbers<[1], [0], [0], [1], [0, 0, 1, 1], [], []>} : vector<8x128xbf16>, vector<128x512xbf16>, vector<8x512xf32> -> vector<8x512xf32>
    %82 = arith.index_cast %c0_i32 : i32 to index
    %c0_31 = arith.constant 0 : index
    %c0_32 = arith.constant 0 : index
    %83 = vector.load %arg10[%82, %c0_31, %c0_32] : memref<2x1x512xf32, #tpu.memory_space<vmem>>, vector<1x1x512xf32>
    %84 = vector.shape_cast %83 : vector<1x1x512xf32> to vector<1x512xf32>
    %85 = vector.broadcast %84 : vector<1x512xf32> to vector<8x512xf32>
    %86 = arith.addf %81, %85 : vector<8x512xf32>
    %cst_33 = arith.constant 5.000000e-01 : f32
    %87 = vector.broadcast %cst_33 : f32 to vector<8x512xf32>
    %88 = arith.mulf %87, %86 : vector<8x512xf32>
    %cst_34 = arith.constant 4.471500e-02 : f32
    %89 = vector.broadcast %cst_34 : f32 to vector<8x512xf32>
    %90 = arith.mulf %89, %86 : vector<8x512xf32>
    %91 = arith.mulf %90, %86 : vector<8x512xf32>
    %92 = arith.mulf %91, %86 : vector<8x512xf32>
    %93 = arith.addf %86, %92 : vector<8x512xf32>
    %cst_35 = arith.constant 0.797884583 : f32
    %94 = vector.broadcast %cst_35 : f32 to vector<8x512xf32>
    %95 = arith.mulf %94, %93 : vector<8x512xf32>
    %96 = math.tanh %95 : vector<8x512xf32>
    %cst_36 = arith.constant 1.000000e+00 : f32
    %97 = vector.broadcast %cst_36 : f32 to vector<8x512xf32>
    %98 = arith.addf %97, %96 : vector<8x512xf32>
    %99 = arith.mulf %88, %98 : vector<8x512xf32>
    %100 = arith.truncf %99 : vector<8x512xf32> to vector<8x512xbf16>
    %101 = arith.index_cast %c0_i32 : i32 to index
    %c0_37 = arith.constant 0 : index
    %c0_38 = arith.constant 0 : index
    %102 = vector.load %arg11[%101, %c0_37, %c0_38] : memref<2x512x128xbf16, #tpu.memory_space<vmem>>, vector<1x512x128xbf16>
    %103 = vector.shape_cast %102 : vector<1x512x128xbf16> to vector<512x128xbf16>
    %cst_39 = arith.constant dense<0.000000e+00> : vector<8x128xf32>
    %104 = tpu.matmul %100, %103, %cst_39 {dimension_numbers = #tpu.dot_dimension_numbers<[1], [0], [0], [1], [0, 0, 1, 1], [], []>} : vector<8x512xbf16>, vector<512x128xbf16>, vector<8x128xf32> -> vector<8x128xf32>
    %105 = arith.index_cast %c0_i32 : i32 to index
    %c0_40 = arith.constant 0 : index
    %c0_41 = arith.constant 0 : index
    %106 = vector.load %arg12[%105, %c0_40, %c0_41] : memref<2x1x128xf32, #tpu.memory_space<vmem>>, vector<1x1x128xf32>
    %107 = vector.shape_cast %106 : vector<1x1x128xf32> to vector<1x128xf32>
    %108 = vector.broadcast %107 : vector<1x128xf32> to vector<8x128xf32>
    %109 = arith.addf %104, %108 : vector<8x128xf32>
    %110 = arith.addf %76, %109 : vector<8x128xf32>
    %111 = arith.index_cast %c0_i32 : i32 to index
    %c0_42 = arith.constant 0 : index
    %c0_43 = arith.constant 0 : index
    %112 = vector.load %arg13[%111, %c0_42, %c0_43] : memref<2x1x128xf32, #tpu.memory_space<vmem>>, vector<1x1x128xf32>
    %113 = vector.shape_cast %112 : vector<1x1x128xf32> to vector<1x128xf32>
    %114 = arith.index_cast %c0_i32 : i32 to index
    %c0_44 = arith.constant 0 : index
    %c0_45 = arith.constant 0 : index
    %115 = vector.load %arg14[%114, %c0_44, %c0_45] : memref<2x1x128xf32, #tpu.memory_space<vmem>>, vector<1x1x128xf32>
    %116 = vector.shape_cast %115 : vector<1x1x128xf32> to vector<1x128xf32>
    %cst_46 = arith.constant dense<0.000000e+00> : vector<8xf32>
    %117 = vector.multi_reduction <add>, %110, %cst_46 [1] : vector<8x128xf32> to vector<8xf32>
    %118 = vector.shape_cast %117 : vector<8xf32> to vector<8x1xf32>
    %cst_47 = arith.constant 1.280000e+02 : f32
    %119 = vector.broadcast %cst_47 : f32 to vector<8x1xf32>
    %120 = arith.divf %118, %119 : vector<8x1xf32>
    %121 = vector.broadcast %120 : vector<8x1xf32> to vector<8x128xf32>
    %122 = arith.subf %110, %121 : vector<8x128xf32>
    %123 = arith.mulf %122, %122 : vector<8x128xf32>
    %cst_48 = arith.constant dense<0.000000e+00> : vector<8xf32>
    %124 = vector.multi_reduction <add>, %123, %cst_48 [1] : vector<8x128xf32> to vector<8xf32>
    %125 = vector.shape_cast %124 : vector<8xf32> to vector<8x1xf32>
    %cst_49 = arith.constant 1.280000e+02 : f32
    %126 = vector.broadcast %cst_49 : f32 to vector<8x1xf32>
    %127 = arith.divf %125, %126 : vector<8x1xf32>
    %128 = vector.broadcast %120 : vector<8x1xf32> to vector<8x128xf32>
    %129 = arith.subf %110, %128 : vector<8x128xf32>
    %cst_50 = arith.constant 9.99999996E-13 : f32
    %130 = vector.broadcast %cst_50 : f32 to vector<8x1xf32>
    %131 = arith.addf %127, %130 : vector<8x1xf32>
    %132 = math.rsqrt %131 : vector<8x1xf32>
    %133 = vector.broadcast %132 : vector<8x1xf32> to vector<8x128xf32>
    %134 = arith.mulf %129, %133 : vector<8x128xf32>
    %135 = vector.broadcast %113 : vector<1x128xf32> to vector<8x128xf32>
    %136 = arith.mulf %134, %135 : vector<8x128xf32>
    %137 = vector.broadcast %116 : vector<1x128xf32> to vector<8x128xf32>
    %138 = arith.addf %136, %137 : vector<8x128xf32>
    %139 = vector.shape_cast %138 : vector<8x128xf32> to vector<1x8x128xf32>
    %c1_i32 = arith.constant 1 : i32
    %140 = vector.shape_cast %139 : vector<1x8x128xf32> to vector<8x128xf32>
    %141 = arith.truncf %140 : vector<8x128xf32> to vector<8x128xbf16>
    %142 = arith.index_cast %c1_i32 : i32 to index
    %c0_51 = arith.constant 0 : index
    %c0_52 = arith.constant 0 : index
    %143 = vector.load %arg3[%142, %c0_51, %c0_52] : memref<2x128x384xbf16, #tpu.memory_space<vmem>>, vector<1x128x384xbf16>
    %144 = vector.shape_cast %143 : vector<1x128x384xbf16> to vector<128x384xbf16>
    %cst_53 = arith.constant dense<0.000000e+00> : vector<8x384xf32>
    %145 = tpu.matmul %141, %144, %cst_53 {dimension_numbers = #tpu.dot_dimension_numbers<[1], [0], [0], [1], [0, 0, 1, 1], [], []>} : vector<8x128xbf16>, vector<128x384xbf16>, vector<8x384xf32> -> vector<8x384xf32>
    %146 = arith.index_cast %c1_i32 : i32 to index
    %c0_54 = arith.constant 0 : index
    %c0_55 = arith.constant 0 : index
    %147 = vector.load %arg4[%146, %c0_54, %c0_55] : memref<2x1x384xf32, #tpu.memory_space<vmem>>, vector<1x1x384xf32>
    %148 = vector.shape_cast %147 : vector<1x1x384xf32> to vector<1x384xf32>
    %149 = vector.broadcast %148 : vector<1x384xf32> to vector<8x384xf32>
    %150 = arith.addf %145, %149 : vector<8x384xf32>
    %151 = vector.shape_cast %150 : vector<8x384xf32> to vector<1x8x384xf32>
    %152 = vector.extract_strided_slice %151 {offsets = [0, 0, 0], sizes = [1, 8, 128], strides = [1, 1, 1]} : vector<1x8x384xf32> to vector<1x8x128xf32>
    %153 = vector.extract_strided_slice %151 {offsets = [0, 0, 128], sizes = [1, 8, 128], strides = [1, 1, 1]} : vector<1x8x384xf32> to vector<1x8x128xf32>
    %154 = vector.extract_strided_slice %151 {offsets = [0, 0, 256], sizes = [1, 8, 128], strides = [1, 1, 1]} : vector<1x8x384xf32> to vector<1x8x128xf32>
    %155 = arith.truncf %152 : vector<1x8x128xf32> to vector<1x8x128xbf16>
    %156 = arith.truncf %153 : vector<1x8x128xf32> to vector<1x8x128xbf16>
    "tpu.trace_start"() <{level = 10 : i32, message = "bqd,bkd->bqk"}> : () -> ()
    %cst_56 = arith.constant dense<0.000000e+00> : vector<1x8x8xf32>
    %157 = tpu.matmul %155, %156, %cst_56 {dimension_numbers = #tpu.dot_dimension_numbers<[2], [2], [1], [1], [0, 0, 0, 1, 1, 1], [0], [0]>} : vector<1x8x128xbf16>, vector<1x8x128xbf16>, vector<1x8x8xf32> -> vector<1x8x8xf32>
    "tpu.trace_stop"() : () -> ()
    %cst_57 = arith.constant 0.0883883461 : f32
    %158 = vector.broadcast %cst_57 : f32 to vector<1x8x8xf32>
    %159 = arith.mulf %157, %158 : vector<1x8x8xf32>
    %160 = vector.broadcast %1 : vector<1x1x8xf32> to vector<1x8x8xf32>
    %161 = arith.addf %159, %160 : vector<1x8x8xf32>
    %cst_58 = arith.constant dense<0xFF800000> : vector<1x8xf32>
    %162 = vector.multi_reduction <maximumf>, %161, %cst_58 [2] : vector<1x8x8xf32> to vector<1x8xf32>
    %163 = vector.shape_cast %162 : vector<1x8xf32> to vector<1x8x1xf32>
    %164 = vector.broadcast %163 : vector<1x8x1xf32> to vector<1x8x8xf32>
    %165 = arith.subf %161, %164 : vector<1x8x8xf32>
    %166 = math.exp %165 : vector<1x8x8xf32>
    %cst_59 = arith.constant dense<0.000000e+00> : vector<1x8xf32>
    %167 = vector.multi_reduction <add>, %166, %cst_59 [2] : vector<1x8x8xf32> to vector<1x8xf32>
    %168 = vector.shape_cast %167 : vector<1x8xf32> to vector<1x8x1xf32>
    %169 = tpu.reciprocal %168 {approx = true} : vector<1x8x1xf32> -> vector<1x8x1xf32>
    %170 = vector.broadcast %169 : vector<1x8x1xf32> to vector<1x8x8xf32>
    %171 = arith.mulf %166, %170 : vector<1x8x8xf32>
    %172 = arith.truncf %171 : vector<1x8x8xf32> to vector<1x8x8xbf16>
    %173 = arith.truncf %154 : vector<1x8x128xf32> to vector<1x8x128xbf16>
    "tpu.trace_start"() <{level = 10 : i32, message = "bqk,bkd->bqd"}> : () -> ()
    %cst_60 = arith.constant dense<0.000000e+00> : vector<1x8x128xf32>
    %174 = tpu.matmul %172, %173, %cst_60 {dimension_numbers = #tpu.dot_dimension_numbers<[2], [1], [1], [2], [0, 0, 0, 1, 1, 2], [0], [0]>} : vector<1x8x8xbf16>, vector<1x8x128xbf16>, vector<1x8x128xf32> -> vector<1x8x128xf32>
    "tpu.trace_stop"() : () -> ()
    %175 = vector.shape_cast %174 : vector<1x8x128xf32> to vector<8x128xf32>
    %176 = arith.truncf %175 : vector<8x128xf32> to vector<8x128xbf16>
    %177 = arith.index_cast %c1_i32 : i32 to index
    %c0_61 = arith.constant 0 : index
    %c0_62 = arith.constant 0 : index
    %178 = vector.load %arg5[%177, %c0_61, %c0_62] : memref<2x128x128xbf16, #tpu.memory_space<vmem>>, vector<1x128x128xbf16>
    %179 = vector.shape_cast %178 : vector<1x128x128xbf16> to vector<128x128xbf16>
    %cst_63 = arith.constant dense<0.000000e+00> : vector<8x128xf32>
    %180 = tpu.matmul %176, %179, %cst_63 {dimension_numbers = #tpu.dot_dimension_numbers<[1], [0], [0], [1], [0, 0, 1, 1], [], []>} : vector<8x128xbf16>, vector<128x128xbf16>, vector<8x128xf32> -> vector<8x128xf32>
    %181 = arith.index_cast %c1_i32 : i32 to index
    %c0_64 = arith.constant 0 : index
    %c0_65 = arith.constant 0 : index
    %182 = vector.load %arg6[%181, %c0_64, %c0_65] : memref<2x1x128xf32, #tpu.memory_space<vmem>>, vector<1x1x128xf32>
    %183 = vector.shape_cast %182 : vector<1x1x128xf32> to vector<1x128xf32>
    %184 = vector.broadcast %183 : vector<1x128xf32> to vector<8x128xf32>
    %185 = arith.addf %180, %184 : vector<8x128xf32>
    %186 = arith.addf %140, %185 : vector<8x128xf32>
    %187 = arith.index_cast %c1_i32 : i32 to index
    %c0_66 = arith.constant 0 : index
    %c0_67 = arith.constant 0 : index
    %188 = vector.load %arg7[%187, %c0_66, %c0_67] : memref<2x1x128xf32, #tpu.memory_space<vmem>>, vector<1x1x128xf32>
    %189 = vector.shape_cast %188 : vector<1x1x128xf32> to vector<1x128xf32>
    %190 = arith.index_cast %c1_i32 : i32 to index
    %c0_68 = arith.constant 0 : index
    %c0_69 = arith.constant 0 : index
    %191 = vector.load %arg8[%190, %c0_68, %c0_69] : memref<2x1x128xf32, #tpu.memory_space<vmem>>, vector<1x1x128xf32>
    %192 = vector.shape_cast %191 : vector<1x1x128xf32> to vector<1x128xf32>
    %cst_70 = arith.constant dense<0.000000e+00> : vector<8xf32>
    %193 = vector.multi_reduction <add>, %186, %cst_70 [1] : vector<8x128xf32> to vector<8xf32>
    %194 = vector.shape_cast %193 : vector<8xf32> to vector<8x1xf32>
    %cst_71 = arith.constant 1.280000e+02 : f32
    %195 = vector.broadcast %cst_71 : f32 to vector<8x1xf32>
    %196 = arith.divf %194, %195 : vector<8x1xf32>
    %197 = vector.broadcast %196 : vector<8x1xf32> to vector<8x128xf32>
    %198 = arith.subf %186, %197 : vector<8x128xf32>
    %199 = arith.mulf %198, %198 : vector<8x128xf32>
    %cst_72 = arith.constant dense<0.000000e+00> : vector<8xf32>
    %200 = vector.multi_reduction <add>, %199, %cst_72 [1] : vector<8x128xf32> to vector<8xf32>
    %201 = vector.shape_cast %200 : vector<8xf32> to vector<8x1xf32>
    %cst_73 = arith.constant 1.280000e+02 : f32
    %202 = vector.broadcast %cst_73 : f32 to vector<8x1xf32>
    %203 = arith.divf %201, %202 : vector<8x1xf32>
    %204 = vector.broadcast %196 : vector<8x1xf32> to vector<8x128xf32>
    %205 = arith.subf %186, %204 : vector<8x128xf32>
    %cst_74 = arith.constant 9.99999996E-13 : f32
    %206 = vector.broadcast %cst_74 : f32 to vector<8x1xf32>
    %207 = arith.addf %203, %206 : vector<8x1xf32>
    %208 = math.rsqrt %207 : vector<8x1xf32>
    %209 = vector.broadcast %208 : vector<8x1xf32> to vector<8x128xf32>
    %210 = arith.mulf %205, %209 : vector<8x128xf32>
    %211 = vector.broadcast %189 : vector<1x128xf32> to vector<8x128xf32>
    %212 = arith.mulf %210, %211 : vector<8x128xf32>
    %213 = vector.broadcast %192 : vector<1x128xf32> to vector<8x128xf32>
    %214 = arith.addf %212, %213 : vector<8x128xf32>
    %215 = arith.truncf %214 : vector<8x128xf32> to vector<8x128xbf16>
    %216 = arith.index_cast %c1_i32 : i32 to index
    %c0_75 = arith.constant 0 : index
    %c0_76 = arith.constant 0 : index
    %217 = vector.load %arg9[%216, %c0_75, %c0_76] : memref<2x128x512xbf16, #tpu.memory_space<vmem>>, vector<1x128x512xbf16>
    %218 = vector.shape_cast %217 : vector<1x128x512xbf16> to vector<128x512xbf16>
    %cst_77 = arith.constant dense<0.000000e+00> : vector<8x512xf32>
    %219 = tpu.matmul %215, %218, %cst_77 {dimension_numbers = #tpu.dot_dimension_numbers<[1], [0], [0], [1], [0, 0, 1, 1], [], []>} : vector<8x128xbf16>, vector<128x512xbf16>, vector<8x512xf32> -> vector<8x512xf32>
    %220 = arith.index_cast %c1_i32 : i32 to index
    %c0_78 = arith.constant 0 : index
    %c0_79 = arith.constant 0 : index
    %221 = vector.load %arg10[%220, %c0_78, %c0_79] : memref<2x1x512xf32, #tpu.memory_space<vmem>>, vector<1x1x512xf32>
    %222 = vector.shape_cast %221 : vector<1x1x512xf32> to vector<1x512xf32>
    %223 = vector.broadcast %222 : vector<1x512xf32> to vector<8x512xf32>
    %224 = arith.addf %219, %223 : vector<8x512xf32>
    %cst_80 = arith.constant 5.000000e-01 : f32
    %225 = vector.broadcast %cst_80 : f32 to vector<8x512xf32>
    %226 = arith.mulf %225, %224 : vector<8x512xf32>
    %cst_81 = arith.constant 4.471500e-02 : f32
    %227 = vector.broadcast %cst_81 : f32 to vector<8x512xf32>
    %228 = arith.mulf %227, %224 : vector<8x512xf32>
    %229 = arith.mulf %228, %224 : vector<8x512xf32>
    %230 = arith.mulf %229, %224 : vector<8x512xf32>
    %231 = arith.addf %224, %230 : vector<8x512xf32>
    %cst_82 = arith.constant 0.797884583 : f32
    %232 = vector.broadcast %cst_82 : f32 to vector<8x512xf32>
    %233 = arith.mulf %232, %231 : vector<8x512xf32>
    %234 = math.tanh %233 : vector<8x512xf32>
    %cst_83 = arith.constant 1.000000e+00 : f32
    %235 = vector.broadcast %cst_83 : f32 to vector<8x512xf32>
    %236 = arith.addf %235, %234 : vector<8x512xf32>
    %237 = arith.mulf %226, %236 : vector<8x512xf32>
    %238 = arith.truncf %237 : vector<8x512xf32> to vector<8x512xbf16>
    %239 = arith.index_cast %c1_i32 : i32 to index
    %c0_84 = arith.constant 0 : index
    %c0_85 = arith.constant 0 : index
    %240 = vector.load %arg11[%239, %c0_84, %c0_85] : memref<2x512x128xbf16, #tpu.memory_space<vmem>>, vector<1x512x128xbf16>
    %241 = vector.shape_cast %240 : vector<1x512x128xbf16> to vector<512x128xbf16>
    %cst_86 = arith.constant dense<0.000000e+00> : vector<8x128xf32>
    %242 = tpu.matmul %238, %241, %cst_86 {dimension_numbers = #tpu.dot_dimension_numbers<[1], [0], [0], [1], [0, 0, 1, 1], [], []>} : vector<8x512xbf16>, vector<512x128xbf16>, vector<8x128xf32> -> vector<8x128xf32>
    %243 = arith.index_cast %c1_i32 : i32 to index
    %c0_87 = arith.constant 0 : index
    %c0_88 = arith.constant 0 : index
    %244 = vector.load %arg12[%243, %c0_87, %c0_88] : memref<2x1x128xf32, #tpu.memory_space<vmem>>, vector<1x1x128xf32>
    %245 = vector.shape_cast %244 : vector<1x1x128xf32> to vector<1x128xf32>
    %246 = vector.broadcast %245 : vector<1x128xf32> to vector<8x128xf32>
    %247 = arith.addf %242, %246 : vector<8x128xf32>
    %248 = arith.addf %214, %247 : vector<8x128xf32>
    %249 = arith.index_cast %c1_i32 : i32 to index
    %c0_89 = arith.constant 0 : index
    %c0_90 = arith.constant 0 : index
    %250 = vector.load %arg13[%249, %c0_89, %c0_90] : memref<2x1x128xf32, #tpu.memory_space<vmem>>, vector<1x1x128xf32>
    %251 = vector.shape_cast %250 : vector<1x1x128xf32> to vector<1x128xf32>
    %252 = arith.index_cast %c1_i32 : i32 to index
    %c0_91 = arith.constant 0 : index
    %c0_92 = arith.constant 0 : index
    %253 = vector.load %arg14[%252, %c0_91, %c0_92] : memref<2x1x128xf32, #tpu.memory_space<vmem>>, vector<1x1x128xf32>
    %254 = vector.shape_cast %253 : vector<1x1x128xf32> to vector<1x128xf32>
    %cst_93 = arith.constant dense<0.000000e+00> : vector<8xf32>
    %255 = vector.multi_reduction <add>, %248, %cst_93 [1] : vector<8x128xf32> to vector<8xf32>
    %256 = vector.shape_cast %255 : vector<8xf32> to vector<8x1xf32>
    %cst_94 = arith.constant 1.280000e+02 : f32
    %257 = vector.broadcast %cst_94 : f32 to vector<8x1xf32>
    %258 = arith.divf %256, %257 : vector<8x1xf32>
    %259 = vector.broadcast %258 : vector<8x1xf32> to vector<8x128xf32>
    %260 = arith.subf %248, %259 : vector<8x128xf32>
    %261 = arith.mulf %260, %260 : vector<8x128xf32>
    %cst_95 = arith.constant dense<0.000000e+00> : vector<8xf32>
    %262 = vector.multi_reduction <add>, %261, %cst_95 [1] : vector<8x128xf32> to vector<8xf32>
    %263 = vector.shape_cast %262 : vector<8xf32> to vector<8x1xf32>
    %cst_96 = arith.constant 1.280000e+02 : f32
    %264 = vector.broadcast %cst_96 : f32 to vector<8x1xf32>
    %265 = arith.divf %263, %264 : vector<8x1xf32>
    %266 = vector.broadcast %258 : vector<8x1xf32> to vector<8x128xf32>
    %267 = arith.subf %248, %266 : vector<8x128xf32>
    %cst_97 = arith.constant 9.99999996E-13 : f32
    %268 = vector.broadcast %cst_97 : f32 to vector<8x1xf32>
    %269 = arith.addf %265, %268 : vector<8x1xf32>
    %270 = math.rsqrt %269 : vector<8x1xf32>
    %271 = vector.broadcast %270 : vector<8x1xf32> to vector<8x128xf32>
    %272 = arith.mulf %267, %271 : vector<8x128xf32>
    %273 = vector.broadcast %251 : vector<1x128xf32> to vector<8x128xf32>
    %274 = arith.mulf %272, %273 : vector<8x128xf32>
    %275 = vector.broadcast %254 : vector<1x128xf32> to vector<8x128xf32>
    %276 = arith.addf %274, %275 : vector<8x128xf32>
    %277 = vector.shape_cast %276 : vector<8x128xf32> to vector<1x8x128xf32>
    %c2_i32 = arith.constant 2 : i32
    %278 = vector.extract_strided_slice %277 {offsets = [0, 0, 0], sizes = [1, 1, 128], strides = [1, 1, 1]} : vector<1x8x128xf32> to vector<1x1x128xf32>
    %279 = vector.shape_cast %278 : vector<1x1x128xf32> to vector<1x128xf32>
    %280 = arith.truncf %279 : vector<1x128xf32> to vector<1x128xbf16>
    %c0_98 = arith.constant 0 : index
    %c0_99 = arith.constant 0 : index
    %281 = vector.load %arg15[%c0_98, %c0_99] : memref<128x128xbf16, #tpu.memory_space<vmem>>, vector<128x128xbf16>
    %cst_100 = arith.constant dense<0.000000e+00> : vector<1x128xf32>
    %282 = tpu.matmul %280, %281, %cst_100 {dimension_numbers = #tpu.dot_dimension_numbers<[1], [0], [0], [1], [0, 0, 1, 1], [], []>} : vector<1x128xbf16>, vector<128x128xbf16>, vector<1x128xf32> -> vector<1x128xf32>
    %c0_101 = arith.constant 0 : index
    %c0_102 = arith.constant 0 : index
    %283 = vector.load %arg16[%c0_101, %c0_102] : memref<1x128xf32, #tpu.memory_space<vmem>>, vector<1x128xf32>
    %284 = arith.addf %282, %283 : vector<1x128xf32>
    %285 = vector.shape_cast %284 : vector<1x128xf32> to vector<1x1x128xf32>
    %c0_103 = arith.constant 0 : index
    %c0_104 = arith.constant 0 : index
    %c0_105 = arith.constant 0 : index
    %286 = vector.load %arg17[%c0_103, %c0_104, %c0_105] : memref<1x1x128xf32, #tpu.memory_space<vmem>>, vector<1x1x128xf32>
    tpu.vector_store %arg17[%c0_103, %c0_104, %c0_105], %285 {strides = array<i32>} : memref<1x1x128xf32, #tpu.memory_space<vmem>>, vector<1x1x128xf32>,
    return
  }
  func.func @transform_0(%arg0: i32) -> (i32, i32, i32) {
    %c0_i32 = arith.constant 0 : i32
    %c0_i32_0 = arith.constant 0 : i32
    %c0_i32_1 = arith.constant 0 : i32
    return %arg0, %c0_i32, %c0_i32_0 : i32, i32, i32
  }
  func.func @transform_1(%arg0: i32) -> (i32, i32, i32) {
    %c0_i32 = arith.constant 0 : i32
    %c0_i32_0 = arith.constant 0 : i32
    %c0_i32_1 = arith.constant 0 : i32
    return %arg0, %c0_i32, %c0_i32_0 : i32, i32, i32
  }
  func.func @transform_2(%arg0: i32) -> (i32, i32, i32) {
    %c0_i32 = arith.constant 0 : i32
    %c0_i32_0 = arith.constant 0 : i32
    %c0_i32_1 = arith.constant 0 : i32
    %c0_i32_2 = arith.constant 0 : i32
    return %c0_i32, %c0_i32_0, %c0_i32_1 : i32, i32, i32
  }
  func.func @transform_3(%arg0: i32) -> (i32, i32, i32) {
    %c0_i32 = arith.constant 0 : i32
    %c0_i32_0 = arith.constant 0 : i32
    %c0_i32_1 = arith.constant 0 : i32
    %c0_i32_2 = arith.constant 0 : i32
    return %c0_i32, %c0_i32_0, %c0_i32_1 : i32, i32, i32
  }
  func.func @transform_4(%arg0: i32) -> (i32, i32, i32) {
    %c0_i32 = arith.constant 0 : i32
    %c0_i32_0 = arith.constant 0 : i32
    %c0_i32_1 = arith.constant 0 : i32
    %c0_i32_2 = arith.constant 0 : i32
    return %c0_i32, %c0_i32_0, %c0_i32_1 : i32, i32, i32
  }
  func.func @transform_5(%arg0: i32) -> (i32, i32, i32) {
    %c0_i32 = arith.constant 0 : i32
    %c0_i32_0 = arith.constant 0 : i32
    %c0_i32_1 = arith.constant 0 : i32
    %c0_i32_2 = arith.constant 0 : i32
    return %c0_i32, %c0_i32_0, %c0_i32_1 : i32, i32, i32
  }
  func.func @transform_6(%arg0: i32) -> (i32, i32, i32) {
    %c0_i32 = arith.constant 0 : i32
    %c0_i32_0 = arith.constant 0 : i32
    %c0_i32_1 = arith.constant 0 : i32
    %c0_i32_2 = arith.constant 0 : i32
    return %c0_i32, %c0_i32_0, %c0_i32_1 : i32, i32, i32
  }
  func.func @transform_7(%arg0: i32) -> (i32, i32, i32) {
    %c0_i32 = arith.constant 0 : i32
    %c0_i32_0 = arith.constant 0 : i32
    %c0_i32_1 = arith.constant 0 : i32
    %c0_i32_2 = arith.constant 0 : i32
    return %c0_i32, %c0_i32_0, %c0_i32_1 : i32, i32, i32
  }
  func.func @transform_8(%arg0: i32) -> (i32, i32, i32) {
    %c0_i32 = arith.constant 0 : i32
    %c0_i32_0 = arith.constant 0 : i32
    %c0_i32_1 = arith.constant 0 : i32
    %c0_i32_2 = arith.constant 0 : i32
    return %c0_i32, %c0_i32_0, %c0_i32_1 : i32, i32, i32
  }
  func.func @transform_9(%arg0: i32) -> (i32, i32, i32) {
    %c0_i32 = arith.constant 0 : i32
    %c0_i32_0 = arith.constant 0 : i32
    %c0_i32_1 = arith.constant 0 : i32
    %c0_i32_2 = arith.constant 0 : i32
    return %c0_i32, %c0_i32_0, %c0_i32_1 : i32, i32, i32
  }
  func.func @transform_10(%arg0: i32) -> (i32, i32, i32) {
    %c0_i32 = arith.constant 0 : i32
    %c0_i32_0 = arith.constant 0 : i32
    %c0_i32_1 = arith.constant 0 : i32
    %c0_i32_2 = arith.constant 0 : i32
    return %c0_i32, %c0_i32_0, %c0_i32_1 : i32, i32, i32
  }
  func.func @transform_11(%arg0: i32) -> (i32, i32, i32) {
    %c0_i32 = arith.constant 0 : i32
    %c0_i32_0 = arith.constant 0 : i32
    %c0_i32_1 = arith.constant 0 : i32
    %c0_i32_2 = arith.constant 0 : i32
    return %c0_i32, %c0_i32_0, %c0_i32_1 : i32, i32, i32
  }
  func.func @transform_12(%arg0: i32) -> (i32, i32, i32) {
    %c0_i32 = arith.constant 0 : i32
    %c0_i32_0 = arith.constant 0 : i32
    %c0_i32_1 = arith.constant 0 : i32
    %c0_i32_2 = arith.constant 0 : i32
    return %c0_i32, %c0_i32_0, %c0_i32_1 : i32, i32, i32
  }
  func.func @transform_13(%arg0: i32) -> (i32, i32, i32) {
    %c0_i32 = arith.constant 0 : i32
    %c0_i32_0 = arith.constant 0 : i32
    %c0_i32_1 = arith.constant 0 : i32
    %c0_i32_2 = arith.constant 0 : i32
    return %c0_i32, %c0_i32_0, %c0_i32_1 : i32, i32, i32
  }
  func.func @transform_14(%arg0: i32) -> (i32, i32) {
    %c0_i32 = arith.constant 0 : i32
    %c0_i32_0 = arith.constant 0 : i32
    %c0_i32_1 = arith.constant 0 : i32
    return %c0_i32, %c0_i32_0 : i32, i32
  }
  func.func @transform_15(%arg0: i32) -> (i32, i32) {
    %c0_i32 = arith.constant 0 : i32
    %c0_i32_0 = arith.constant 0 : i32
    %c0_i32_1 = arith.constant 0 : i32
    return %c0_i32, %c0_i32_0 : i32, i32
  }
  func.func @transform_16(%arg0: i32) -> (i32, i32, i32) {
    %c0_i32 = arith.constant 0 : i32
    %c0_i32_0 = arith.constant 0 : i32
    %c0_i32_1 = arith.constant 0 : i32
    return %arg0, %c0_i32, %c0_i32_0 : i32, i32, i32
  }
}

</mosaic_0001>

<bundles_post_ra>
// kernel: tpu_custom_call.1
= control target key start
LH: loop header
LB: loop body
LE: loop exit
PB: predicated region body
PF: predicated region fallthrough
CT: control target
= control target key end

     0   :  { %s5145_s0 = inlined_call_operand.hbm [shape: f32[2,8,128], index: 0, kind: input, shape index: {}]   ;;  %s5146_s1 = inlined_call_operand.hbm [shape: f32[2,1,8], index: 1, kind: input, shape index: {}]   ;;  %s5147_s2 = inlined_call_operand.hbm [shape: bf16[2,128,384], index: 2, kind: input, shape index: {}]   ;;  %s5148_s3 = inlined_call_operand.hbm [shape: f32[2,1,384], index: 3, kind: input, shape index: {}]   ;;  %s5149_s4 = inlined_call_operand.hbm [shape: bf16[2,128,128], index: 4, kind: input, shape index: {}]   ;;  %s5150_s5 = inlined_call_operand.vmem [shape: f32[2,1,128], index: 5, kind: input, shape index: {}]   ;;  %s5151_s6 = inlined_call_operand.vmem [shape: f32[2,1,128], index: 6, kind: input, shape index: {}]   ;;  %s5152_s7 = inlined_call_operand.vmem [shape: f32[2,1,128], index: 7, kind: input, shape index: {}]   ;;  %s5153_s8 = inlined_call_operand.hbm [shape: bf16[2,128,512], index: 8, kind: input, shape index: {}]   ;;  %s5154_s9 = inlined_call_operand.vmem [shape: f32[2,1,512], index: 9, kind: input, shape index: {}]   ;;  %s5155_s10 = inlined_call_operand.hbm [shape: bf16[2,512,128], index: 10, kind: input, shape index: {}]   ;;  %s5156_s11 = inlined_call_operand.vmem [shape: f32[2,1,128], index: 11, kind: input, shape index: {}]   ;;  %s5157_s12 = inlined_call_operand.vmem [shape: f32[2,1,128], index: 12, kind: input, shape index: {}]   ;;  %s5158_s13 = inlined_call_operand.vmem [shape: f32[2,1,128], index: 13, kind: input, shape index: {}]   ;;  %s5159_s14 = inlined_call_operand.hbm [shape: bf16[128,128], index: 14, kind: input, shape index: {}]   ;;  %s5160_s15 = inlined_call_operand.vmem [shape: f32[1,128], index: 15, kind: input, shape index: {}]   ;;  %s5161_s16 = inlined_call_operand.hbm [shape: f32[2,1,128], index: 16, kind: output, shape index: {}]  }
   0x1   :  { %5173 = sst [smem:[#allocation27_spill]] %s5145_s0 }
   0x2   :  { %5174 = sst [smem:[#allocation28_spill]] %s5147_s2 }
   0x3   :  { %5175 = sst [smem:[#allocation29_spill]] %s5148_s3 }
   0x4   :  { %5176 = sst [smem:[#allocation30_spill]] %s5149_s4 }
   0x5   :  { %5177 = sst [smem:[#allocation31_spill]] %s5153_s8 }
   0x6   :  { %5178 = sst [smem:[#allocation32_spill]] %s5155_s10 }
   0x7   :  { %5179 = sst [smem:[#allocation33_spill]] %s5158_s13 }
   0x8   :  { %5180 = sst [smem:[#allocation34_spill]] %s5159_s14 }
   0x9   :  { %5181 = sst [smem:[#allocation35_spill]] %s5160_s15 }
   0xa   :  { %5182 = sst [smem:[#allocation36_spill]] %s5161_s16 }
   0xb   :  { %21 = vsyncpa [#allocation3], 0 }
   0xc   :  { %23 = vsyncpa [#allocation3 + $0x1], 0 }
   0xd   :  { %24 = vsyncpa [#allocation6], 0 }
   0xe   :  { %26 = vsyncpa [#allocation6 + $0x1], 0 }
   0xf   :  { %27 = vsyncpa [#allocation9], 0 }
  0x10   :  { %28 = vsyncpa [#allocation12], 0 }
  0x11   :  { %29 = vsyncpa [#allocation15], 0 }
  0x12   :  { %30 = vsyncpa [#allocation4], 0 }
  0x13   :  { %32 = vsyncpa [#allocation4 + $0x1], 0  ;;  %s4680_s21 = smov 0   ;;  %s4682_s22 = smov 0  }
  0x14   :  { %s4684_s23 = smov 0   ;;  %s4686_s24 = smov 0  }
  0x15 LB: > { %5183 = sst [smem:[#allocation24_spill]] %s4569_s23  ;;  %s4575_s25 = smov [#allocation7]   ;;  %s4573_s24 = sphi %s4686_s24, %s5218_s24   ;;  %s4569_s23 = sphi %s4684_s23, %s5220_s23   ;;  %s4565_s22 = sphi %s4682_s22, %s5222_s22   ;;  %s4561_s21 = sphi %s4680_s21, %s5221_s21  }
  0x16   : > { %s427_s26 = sshll.u32 %s4575_s25, 4  ;;  %s4701_s27 = sadd.s32 4294967295, %s4573_s24   ;;  %s428_s26 = int_to_ptr.vmem [resolvable:$true] %s427_s26 }
  0x17   : > { %p3365_p0 = scmp.ge.s32.totalorder %s4573_s24, 1  ;;  %p5165_p1 = scmp.eq.s32.totalorder %s4701_s27, 0 }
  0x18   : > { %p415_p2 = scmp.lt.s32.totalorder %s4573_s24, 3  ;;  %s4576_s29 = smov [#allocation8]  }
  0x19   : > { %s440_s30 = sshll.u32 %s4576_s29, 4  ;;  %s4577_s17 = smov [#allocation11]   ;;  %s4719_s30 = int_to_ptr.vmem [resolvable:$true] %s440_s30 }
  0x1a   : > { %p4706_p3 = pnand %p3365_p0, %p415_p2  ;;  %s4721_s18 = sshll.u32 %s4577_s17, 4  ;;  %s476_s18 = int_to_ptr.vmem [resolvable:$true] %s4721_s18 }
  0x1b   : > { %s4288_s20 = scalar_lea.vmem %s428_s26, 6144  ;;  %p4296_p11 = scmp.lt.s32.totalorder %s428_s26, %s428_s26 }
  0x1c   : > { %s5184_s28 = scalar_select %p4706_p3, 1, 0 }
  0x1d   : > { %p3904_p5 = pneg %p4706_p3  ;;  %p4289_p8 = scmp.ne.s32.totalorder %s428_s26, %s4288_s20 }
  0x1e   : > { %p4297_p12 = scmp.lt.s32.totalorder %s4288_s20, %s4288_s20 }
  0x1f   : > { %p4715_p6 = pnand %p3904_p5, %p5165_p1 }
  0x20   : > { %p4298_p13 = por %p4297_p12, %p4296_p11 }
  0x21   : > { %p4725_p7 = pneg %p4715_p6 }
  0x23   : > { %p4291_p9 = pnand %p4289_p8, %p4725_p7 }
  0x25   : > { %p4292_p10 = pneg %p4291_p9 }
  0x27   : > { %p4299_p0 = pnand %p4298_p13, %p4292_p10 }
  0x29   : > { %4302 = shalt.err (!%p4299_p0)
}
  0x2a   : > { %s4578_s25 = smov 192   ;;  %s4579_s29 = smov 12  }
  0x2b   : > { %s5187_s2 = sld [smem:[#allocation28_spill]]  ;;  %s4314_s15 = scalar_lea.vmem %s4719_s30, 96 }
  0x2c   : > { %p4315_p2 = scmp.ne.s32.totalorder %s4719_s30, %s4314_s15  ;;  %p4322_p9 = scmp.lt.s32.totalorder %s4719_s30, %s4719_s30 }
  0x2d   : > { %p4323_p10 = scmp.lt.s32.totalorder %s4314_s15, %s4314_s15 }
  0x2e   : > { %p4317_p5 = pnand %p4315_p2, %p4725_p7 }
  0x2f   : > { %p4324_p11 = por %p4323_p10, %p4322_p9 }
  0x30   : > { %p4318_p8 = pneg %p4317_p5 }
  0x31   : > { %3907 = dma.hbm_to_vmem [thread:$0]  (!%p4715_p6), %s5187_s2, 6144, %s428_s26, [#allocation6], %s4578_s25, %s4578_s25, %s4579_s29  }
  0x32   : > { %p4325_p12 = pnand %p4324_p11, %p4318_p8 }
  0x34   : > { %4328 = shalt.err (!%p4325_p12)
}
  0x35   : > { %s4580_s20 = smov 48   ;;  %s4581_s13 = smov 3  }
  0x36   : > { %s5188_s3 = sld [smem:[#allocation29_spill]]  ;;  %s4340_s25 = scalar_lea.vmem %s476_s18, 8192 }
  0x37   : > { %p4341_p13 = scmp.ne.s32.totalorder %s476_s18, %s4340_s25  ;;  %p4348_p5 = scmp.lt.s32.totalorder %s476_s18, %s476_s18 }
  0x38   : > { %p4349_p8 = scmp.lt.s32.totalorder %s4340_s25, %s4340_s25 }
  0x39   : > { %p4343_p0 = pnand %p4341_p13, %p4725_p7 }
  0x3a   : > { %p4350_p9 = por %p4349_p8, %p4348_p5 }
  0x3b   : > { %p4344_p2 = pneg %p4343_p0 }
  0x3c   : > { %3910 = dma.hbm_to_vmem [thread:$0]  (!%p4715_p6), %s5188_s3, 96, %s4719_s30, [#allocation9], %s4580_s20, %s4580_s20, %s4581_s13  }
  0x3d   : > { %p4351_p10 = pnand %p4350_p9, %p4344_p2 }
  0x3f   : > { %4354 = shalt.err (!%p4351_p10)
}
  0x40   : > { %s4582_s15 = smov 256   ;;  %s4583_s29 = smov 16  }
  0x41   : > { %s5189_s8 = sld [smem:[#allocation31_spill]]  ;;  %s4584_s13 = smov [#allocation10]  }
  0x42   : > { %s453_s30 = sshll.u32 %s4584_s13, 4  ;;  %s454_s30 = int_to_ptr.vmem [resolvable:$true] %s453_s30 }
  0x43   : > { %s4366_s20 = scalar_lea.vmem %s454_s30, 2048  ;;  %p4374_p0 = scmp.lt.s32.totalorder %s454_s30, %s454_s30 }
  0x44   : > { %p4367_p11 = scmp.ne.s32.totalorder %s454_s30, %s4366_s20  ;;  %p4375_p2 = scmp.lt.s32.totalorder %s4366_s20, %s4366_s20 }
  0x46   : > { %p4369_p12 = pnand %p4367_p11, %p4725_p7  ;;  %p4376_p5 = por %p4375_p2, %p4374_p0 }
  0x47   : > { %3916 = dma.hbm_to_vmem [thread:$0]  (!%p4715_p6), %s5189_s8, 8192, %s476_s18, [#allocation12], %s4582_s15, %s4582_s15, %s4583_s29  }
  0x48   : > { %p4370_p13 = pneg %p4369_p12 }
  0x4a   : > { %p4377_p8 = pnand %p4376_p5, %p4370_p13 }
  0x4c   : > { %4380 = shalt.err (!%p4377_p8)
}
  0x4d   : > { %s4585_s16 = smov 64   ;;  %s4586_s26 = smov 4  }
  0x4e   : > { %s5190_s4 = sld [smem:[#allocation30_spill]]  ;;  %s4587_s25 = smov [#allocation13]  }
  0x4f   : > { %s491_s15 = sshll.u32 %s4587_s25, 4  ;;  %s4588_s29 = smov [#allocation14]   ;;  %s492_s15 = int_to_ptr.vmem [resolvable:$true] %s491_s15 }
  0x50   : > { %s513_s17 = sshll.u32 %s4588_s29, 4  ;;  %s4392_s13 = scalar_lea.vmem %s492_s15, 8192  ;;  %s514_s17 = int_to_ptr.vmem [resolvable:$true] %s513_s17 }
  0x51   : > { %p4393_p9 = scmp.ne.s32.totalorder %s492_s15, %s4392_s13  ;;  %p4400_p12 = scmp.lt.s32.totalorder %s492_s15, %s492_s15 }
  0x52   : > { %p4401_p13 = scmp.lt.s32.totalorder %s4392_s13, %s4392_s13 }
  0x53   : > { %p4395_p10 = pnand %p4393_p9, %p4725_p7 }
  0x54   : > { %3913 = dma.hbm_to_vmem [thread:$0]  (!%p4715_p6), %s5190_s4, 2048, %s454_s30, [#allocation9], %s4585_s16, %s4585_s16, %s4586_s26  }
  0x55   : > { %p4396_p11 = pneg %p4395_p10  ;;  %p4402_p0 = por %p4401_p13, %p4400_p12 }
  0x57   : > { %p4403_p2 = pnand %p4402_p0, %p4396_p11 }
  0x59   : > { %4406 = shalt.err (!%p4403_p2)
}
  0x5a   : > { %s5191_s10 = sld [smem:[#allocation32_spill]]  ;;  %s4418_s2 = scalar_lea.vmem %s514_s17, 1024 }
  0x5b   : > { %p4419_p5 = scmp.ne.s32.totalorder %s514_s17, %s4418_s2  ;;  %p4426_p10 = scmp.lt.s32.totalorder %s514_s17, %s514_s17 }
  0x5c   : > { %p4427_p4 = scmp.lt.s32.totalorder %s4418_s2, %s4418_s2 }
  0x5d   : > { %p4421_p8 = pnand %p4419_p5, %p4725_p7 }
  0x5e   : > { %p4428_p12 = por %p4427_p4, %p4426_p10 }
  0x5f   : > { %p4422_p9 = pneg %p4421_p8 }
  0x60   : > { %3919 = dma.hbm_to_vmem [thread:$0]  (!%p4715_p6), %s5191_s10, 8192, %s492_s15, [#allocation12], %s4585_s16, %s4585_s16, %s4586_s26  }
  0x61   : > { %p4429_p11 = pnand %p4428_p12, %p4422_p9 }
  0x63   : > { %4432 = shalt.err (!%p4429_p11)
}
  0x64   : > { %s5192_s14 = sld [smem:[#allocation34_spill]]  ;;  %s3364_s0 = sadd.s32 4294967294, %s4573_s24  }
  0x65   : > { %s4788_s19 = sadd.s32 1, %s4573_s24   ;;  %s45_s29 = sadd.s32 1, %s4569_s23 }
  0x66   : > { %5193 = sst [smem:[#allocation25_spill]] %s4788_s19  ;;  %s42_s15 = ssub.s32 %s4573_s24, %s4788_s19 }
  0x67   : > { %p43_p4 = scmp.eq.s32.totalorder %s42_s15, 0  ;;  %p52_p7 = scmp.ne.s32.totalorder %s4569_s23, %s4565_s22 }
  0x68   : > { %p53_p13 = scmp.eq.s32.totalorder %s4573_s24, 0  ;;  %p58_p0 = scmp.ne.s32.totalorder %s4565_s22, %s4561_s21 }
  0x69   : > { %s4799_s13 = scalar_select %p43_p4, %s4569_s23, %s45_s29  }
  0x6a   : > { %3922 = dma.hbm_to_vmem [thread:$0]  (!%p4715_p6), %s5192_s14, 1024, %s514_s17, [#allocation15], %s4585_s16, %s4585_s16, %s4586_s26  }
  0x6b   : > { %5194 = sst [smem:[#allocation26_spill]] %s4799_s13  ;;  %p4801_p2 = por %p53_p13, %p52_p7 }
  0x6c   : > { %p4807_p6 = por %p5165_p1, %p58_p0  ;;  %p402_p5 = scmp.eq.s32.totalorder %s4701_s27, 1 }
  0x6d   : > { %p408_p8 = scmp.eq.s32.totalorder %s3364_s0, 1  ;;  %p3940_p9 = scmp.lt.s32.totalorder %s4573_s24, 2 }
  0x6e   : > { %s5196_s16 = scalar_select %p4807_p6, 1, 0 }
  0x6f   : > { %s4814_s26 = sand.u32 1, %s4569_s23   ;;  %p4816_p10 = por %p402_p5, %p52_p7 }
  0x70   : > { %p4820_p12 = por %p408_p8, %p58_p0  ;;  %s3373_s2 = sshll.u32 %s4814_s26, 3 }
  0x71   : > { %s5197_s17 = scalar_select %p4816_p10, 1, 0 }
  0x72   : > { %s5198_s20 = scalar_select %p4820_p12, 1, 0 }
  0x73   : > { %s3374_s18 = sshll.u32 %s4573_s24, 7  ;;  %s5199_s29 = sld [smem:[#allocation27_spill]] }
  0x74   : > { %s534_s0 = scalar_lea.vmem [#allocation2], %s3373_s2  ;;  %p4835_p11 = pnand %p3940_p9, %p4801_p2 }
  0x75   : > { %s541_s4 = sshll.u32 %s534_s0, 4  ;;  %s531_s14 = scalar_lea.sflag [#allocation3], %s4814_s26  ;;  %s4831_s4 = int_to_ptr.vmem [resolvable:$true] %s541_s4 }
  0x76   : > { %p4435_p7 = pneg %p4835_p11 }
  0x79   : > { %s4829_s3 = scalar_lea.hbm %s5199_s29, %s3374_s18  ;;  %s4438_s30 = scalar_lea.hbm %s5199_s29, 256 }
  0x7a   : > { %s4433_s13 = scalar_lea.hbm %s4829_s3, 128  ;;  %p4439_p2 = scmp.lt.s32.totalorder %s4829_s3, %s5199_s29 }
  0x7b   : > { %p4434_p4 = scmp.ne.s32.totalorder %s4829_s3, %s4433_s13  ;;  %p4440_p5 = scmp.lt.s32.totalorder %s4438_s30, %s4433_s13 }
  0x7d   : > { %p4436_p13 = pnand %p4435_p7, %p4434_p4  ;;  %p4441_p8 = por %p4440_p5, %p4439_p2 }
  0x7f   : > { %p4437_p0 = pneg %p4436_p13 }
  0x81   : > { %p4442_p9 = pnand %p4441_p8, %p4437_p0 }
  0x83   : > { %4445 = shalt.err (!%p4442_p9)
}
  0x84   : > { %s4446_s0 = scalar_lea.vmem %s4831_s4, 128  ;;  %s4589_s2 = smov [#allocation2]  }
  0x85   : > { %p4447_p1 = scmp.ne.s32.totalorder %s4831_s4, %s4446_s0  ;;  %s4451_s18 = sshll.u32 %s4589_s2, 4  ;;  %s4452_s18 = int_to_ptr.vmem [resolvable:$false] %s4451_s18 }
  0x86   : > { %s4453_s10 = scalar_lea.vmem %s4452_s18, 256  ;;  %p4454_p12 = scmp.lt.s32.totalorder %s4831_s4, %s4452_s18 }
  0x87   : > { %p4449_p4 = pnand %p4447_p1, %p4435_p7  ;;  %p4455_p10 = scmp.lt.s32.totalorder %s4453_s10, %s4446_s0 }
  0x89   : > { %p4450_p13 = pneg %p4449_p4  ;;  %p4456_p6 = por %p4455_p10, %p4454_p12 }
  0x8b   : > { %p4457_p2 = pnand %p4456_p6, %p4450_p13 }
  0x8d   : > { %4460 = shalt.err (!%p4457_p2)
}
  0x8e   : > { %3926 = dma.hbm_to_vmem [thread:$0]  (!%p4835_p11), %s4829_s3, 128, %s4831_s4, %s531_s14  }
  0x8f   : > { %s3375_s13 = sshll.u32 %s4573_s24, 4  ;;  %s551_s30 = scalar_lea.vmem [#allocation5], %s4814_s26 }
  0x90   : > { %s558_s25 = sshll.u32 %s551_s30, 4  ;;  %s556_s18 = scalar_lea.hbm %s5146_s1, %s3375_s13  ;;  %s559_s25 = int_to_ptr.vmem [resolvable:$true] %s558_s25 }
  0x91   : > { %s5201_s10 = sand.u32 1, %s4573_s24   ;;  %s4461_s29 = scalar_lea.hbm %s556_s18, 16 }
  0x92   : > { %s549_s0 = scalar_lea.sflag [#allocation6], %s5201_s10  ;;  %p4462_p1 = scmp.ne.s32.totalorder %s556_s18, %s4461_s29 }
  0x93   : > { %s4466_s3 = scalar_lea.hbm %s5146_s1, 32  ;;  %p4467_p12 = scmp.lt.s32.totalorder %s556_s18, %s5146_s1 }
  0x94   : > { %p4464_p6 = pnand %p4462_p1, %p4435_p7  ;;  %p4468_p0 = scmp.lt.s32.totalorder %s4466_s3, %s4461_s29 }
  0x96   : > { %p4465_p10 = pneg %p4464_p6  ;;  %p4469_p5 = por %p4468_p0, %p4467_p12 }
  0x98   : > { %p4470_p8 = pnand %p4469_p5, %p4465_p10 }
  0x9a   : > { %4473 = shalt.err (!%p4470_p8)
}
  0x9b   : > { %s4474_s26 = scalar_lea.vmem %s559_s25, 16  ;;  %s4590_s13 = smov [#allocation5]  }
  0x9c   : > { %p4475_p9 = scmp.ne.s32.totalorder %s559_s25, %s4474_s26  ;;  %s4479_s30 = sshll.u32 %s4590_s13, 4  ;;  %s4480_s30 = int_to_ptr.vmem [resolvable:$false] %s4479_s30 }
  0x9d   : > { %s4481_s23 = scalar_lea.vmem %s4480_s30, 32  ;;  %p4482_p2 = scmp.lt.s32.totalorder %s559_s25, %s4480_s30 }
  0x9e   : > { %p4477_p4 = pnand %p4475_p9, %p4435_p7  ;;  %p4483_p1 = scmp.lt.s32.totalorder %s4481_s23, %s4474_s26 }
  0xa0   : > { %p4478_p13 = pneg %p4477_p4  ;;  %p4484_p6 = por %p4483_p1, %p4482_p2 }
  0xa2   : > { %p4485_p3 = pnand %p4484_p6, %p4478_p13 }
  0xa4   : > { %4488 = shalt.err (!%p4485_p3)
}
  0xa5   : > { %3929 = dma.hbm_to_vmem [thread:$0]  (!%p4835_p11), %s556_s18, 16, %s559_s25, %s549_s0  }
  0xa6   : > { %p5202_p10 = scmp.ne.s32.totalorder %s5184_s28, 0 }
  0xa7   : > { %s4889_s19 = sand.u32 (!%p5202_p10), 1, %s4565_s22   ;;  %p5203_p7 = scmp.ne.s32.totalorder (!%p5202_p10), %s5196_s16, 0 }
  0xa8   : > { %567 = sbr.rel (%p5202_p10) target bundleno = 4745 (0x1289), region = 84  ;;  %s3377_s29 = sshll.u32 (!%p5202_p10), %s4889_s19, 3 }
  0xa9   : > { %s570_s15 = scalar_lea.sflag (!%p5202_p10), [#allocation3], %s4889_s19  ;;  %s4893_s2 = scalar_lea.vmem (!%p5202_p10), [#allocation2], %s3377_s29 }
  0xad   : > { %4532 = dma.done.wait (%p5203_p7), %s570_s15, 128  }
  0xae   : > { %4534 = vsyncadd (%p5203_p7), %s570_s15, 4294967168  ;;  %s578_s8 = sand.u32 1, %s4701_s27   ;;  %s581_s25 = scalar_lea.vmem [#allocation5], %s4889_s19 }
  0xaf   : > { %s579_s28 = scalar_lea.sflag [#allocation6], %s578_s8 }
  0xb0   : > { %4536 = dma.done.wait (%p5203_p7), %s579_s28, 16  }
  0xb1   : > { %4538 = vsyncadd (%p5203_p7), %s579_s28, 4294967280  ;;  %p5204_p3 = scmp.eq.s32.totalorder %s4701_s27, 0 }
  0xb3   : > { %4540 = dma.done.wait (%p5204_p3), [#allocation6], 6144   ;;  %p5205_p11 = pmov %p5204_p3 }
  0xb4   : > { %p5206_p12 = pmov %p5204_p3 }
  0xb5   : > { %4542 = vsyncadd (%p5205_p11), [#allocation6], 4294961152 }
  0xb6   : > { %4544 = dma.done.wait (%p5206_p12), [#allocation9], 2144   ;;  %p5207_p0 = pmov %p5204_p3 }
  0xb8   : > { %4546 = vsyncadd (%p5207_p0), [#allocation9], 4294965152  ;;  %p5208_p5 = pmov %p5207_p0 }
  0xb9   : > { %p5209_p8 = pmov %p5207_p0 }
  0xba   : > { %4548 = dma.done.wait (%p5208_p5), [#allocation12], 16384  }
  0xbb   : > { %4550 = vsyncadd (%p5209_p8), [#allocation12], 4294950912  ;;  %p5210_p9 = pmov %p5207_p0 }
  0xbc   : > { %p5211_p4 = pmov %p5207_p0 }
  0xbd   : > { %4552 = dma.done.wait (%p5210_p9), [#allocation15], 1024  }
  0xbe   : > { %4554 = vsyncadd (%p5211_p4), [#allocation15], 4294966272  ;;  %v4591_v0 = vmov 0   ;;  %v4592_v1 = vmov 0.0   ;;  %vm4593_vm0 = vmmov 0   ;;  %v4929_v23 = vld [vmem:[%s4893_s2] sm:$0xff]  ;;  %v695_v28 = vlaneseq }
  0xbf   : > { %870 = vmatprep.mubr.bf16.mxu0 %v4591_v0  ;;  %3750 = vmatprep.subr.bf16.mxu1 %v4592_v1  ;;  %v3997_v2 = vld [vmem:[#allocation7 + $0xac] ss:$12 sps:$4 sm:$0xff]   ;;  %v3999_v3 = vld [vmem:[#allocation7 + $0xa8] ss:$12 sps:$4 sm:$0xff]   ;;  %v4002_v5 = vld [vmem:[#allocation7 + $0x90] ss:$12 sps:$4 sm:$0xff]   ;;  %v660_v25 = vpack.c.bf16 %v4929_v23, %v4929_v23 }
  0xc0   : > { %3766 = vmatprep.mubr.msk.bf16.mxu1 %vm4593_vm0, %v4592_v1  ;;  %838 = vmatprep.subr.bf16.mxu0 %v3997_v2  ;;  %v4000_v4 = vld [vmem:[#allocation7 + $0x94] ss:$12 sps:$4 sm:$0xff]   ;;  %v4003_v6 = vld [vmem:[#allocation7 + $0x7c] ss:$12 sps:$4 sm:$0xff]   ;;  %v4005_v7 = vld [vmem:[#allocation7 + $0x78] ss:$12 sps:$4 sm:$0xff]  }
  0xc1   : > { %839 = vmatpush1.bf16.msra.mxu0 %v3999_v3  ;;  %v4006_v8 = vld [vmem:[#allocation7 + $0x64] ss:$12 sps:$4 sm:$0xff]   ;;  %v4008_v9 = vld [vmem:[#allocation7 + $0x60] ss:$12 sps:$4 sm:$0xff]   ;;  %v4011_v13 = vld [vmem:[#allocation7 + $0x48] ss:$12 sps:$4 sm:$0xff]  }
  0xc2   : > { %840 = vmatprep.subr.bf16.mxu0 %v4000_v4  ;;  %v4021_v10 = vld [vmem:[#allocation7 + $0xb0] ss:$12 sps:$4 sm:$0xff]   ;;  %v4009_v11 = vld [vmem:[#allocation7 + $0x4c] ss:$12 sps:$4 sm:$0xff]   ;;  %v4012_v14 = vld [vmem:[#allocation7 + $0x34] ss:$12 sps:$4 sm:$0xff]  }
  0xc3   : > { %3751 = vmatpush3.bf16.msra.mxu1 %v4021_v10  ;;  %v4022_v12 = vld [vmem:[#allocation7 + $0x98] ss:$12 sps:$4 sm:$0xff]   ;;  %v4014_v15 = vld [vmem:[#allocation7 + $0x30] ss:$12 sps:$4 sm:$0xff]   ;;  %v4023_v16 = vld [vmem:[#allocation7 + $0x80] ss:$12 sps:$4 sm:$0xff]  }
  0xc4   : > { %3752 = vmatprep.subr.bf16.mxu1 %v4592_v1  ;;  %v4015_v17 = vld [vmem:[#allocation7 + $0x1c] ss:$12 sps:$4 sm:$0xff]   ;;  %v4017_v19 = vld [vmem:[#allocation7 + $0x18] ss:$12 sps:$4 sm:$0xff]   ;;  %v4020_v22 = vld [vmem:[#allocation7] ss:$12 sps:$4 sm:$0xff]  }
  0xc5   : > { %841 = vmatpush1.bf16.msra.mxu0 %v4002_v5  ;;  %v4024_v18 = vld [vmem:[#allocation7 + $0x68] ss:$12 sps:$4 sm:$0xff]   ;;  %v4018_v20 = vld [vmem:[#allocation7 + $0x4] ss:$12 sps:$4 sm:$0xff]   ;;  %v4027_v26 = vld [vmem:[#allocation7 + $0x20] ss:$12 sps:$4 sm:$0xff]  }
  0xc6   : > { %842 = vmatprep.subr.bf16.mxu0 %v4003_v6  ;;  %v4025_v21 = vld [vmem:[#allocation7 + $0x50] ss:$12 sps:$4 sm:$0xff]   ;;  %v4026_v24 = vld [vmem:[#allocation7 + $0x38] ss:$12 sps:$4 sm:$0xff]   ;;  %v4028_v27 = vld [vmem:[#allocation7 + $0x8] ss:$12 sps:$4 sm:$0xff]  }
  0xc7   : > { %3753 = vmatpush3.bf16.msra.mxu1 %v4022_v12  ;;  %v4943_v29 = vshrl.u32 %v695_v28, 7  ;;  %v693_v31 = vld [vmem:[#allocation8] sm:$0x7]  ;;  %vm986_vm1 = vcmask 1043456   ;;  %v4963_v53 = vld [vmem:[%s581_s25] ss:$0 sm:$0xff] }
  0xc8   : > { %3754 = vmatprep.subr.bf16.mxu1 %v4592_v1  ;;  %vm969_vm2 = vcmask 64512   ;;  %v4029_v3 = vld [vmem:[#allocation10 + $0x38] sm:$0xff]   ;;  %v4030_v4 = vld [vmem:[#allocation10 + $0x30] sm:$0xff]   ;;  %v4031_v5 = vld [vmem:[#allocation10 + $0x28] sm:$0xff]   ;;  %s5212_s8 = sld [smem:[#allocation33_spill]]  ;;  %s3606_s25 = sshll.u32 %s4701_s27, 4 }
  0xc9   : > { %843 = vmatpush1.bf16.msra.mxu0 %v4005_v7  ;;  %v4946_v30 = vsub.s32 1, %v4943_v29  ;;  %v4950_v33 = vsub.s32 0, %v4943_v29  ;;  %v4953_v37 = vsub.s32 2, %v4943_v29  ;;  %v4032_v6 = vld [vmem:[#allocation10 + $0x20] sm:$0xff]   ;;  %v4033_v7 = vld [vmem:[#allocation10 + $0x18] sm:$0xff]   ;;  %s5213_s28 = sld [smem:[#allocation35_spill]] }
  0xca   : > { %844 = vmatprep.subr.bf16.mxu0 %v4006_v8  ;;  %v4034_v8 = vld [vmem:[#allocation10 + $0x10] sm:$0xff]   ;;  %s656_s16 = scalar_lea.vmem [#allocation16], %s4889_s19  ;;  %s5214_s3 = sld [smem:[#allocation36_spill]] }
  0xcb   : > { %3755 = vmatpush3.bf16.msra.mxu1 %v4023_v16  ;;  %v702_v32 = vrot.slane %v693_v31, %v4946_v30  ;;  %v698_v38 = vrot.slane %v693_v31, %v4950_v33  ;;  %v706_v42 = vrot.slane %v693_v31, %v4953_v37  ;;  %v4037_v28 = vld [vmem:[#allocation11 + $0xe0] ss:$16 sps:$4 sm:$0xff]   ;;  %v4039_v31 = vld [vmem:[#allocation11 + $0xe4] ss:$16 sps:$4 sm:$0xff]   ;;  %s3221_s18 = sshll.u32 %s656_s16, 4  ;;  %s3209_s14 = scalar_lea.sflag [#allocation4], %s4889_s19  ;;  %s5104_s18 = int_to_ptr.vmem [resolvable:$true] %s3221_s18 }
  0xcc   : > { %3756 = vmatprep.subr.bf16.mxu1 %v4592_v1  ;;  %s4489_s26 = scalar_lea.vmem %s5104_s18, 16  ;;  %p5215_p2 = scmp.ne.s32.totalorder %s5197_s17, 0 }
  0xcd   : > { %845 = vmatpush1.bf16.msra.mxu0 %v4008_v9  ;;  %v4035_v9 = vld [vmem:[#allocation10 + $0x8] sm:$0xff]   ;;  %p4490_p13 = scmp.ne.s32.totalorder %s5104_s18, %s4489_s26  ;;  %s4594_s27 = smov [#allocation16]  }
  0xce   : > { %846 = vmatprep.subr.bf16.mxu0 %v4009_v11  ;;  %s4493_s13 = sshll.u32 %s4594_s27, 4  ;;  %s4494_s13 = int_to_ptr.vmem [resolvable:$false] %s4493_s13 }
  0xcf   : > { %3757 = vmatpush3.bf16.msra.mxu1 %v4024_v18  ;;  %p4491_p1 = pnand %p4490_p13, %p5215_p2  ;;  %s4495_s30 = scalar_lea.vmem %s4494_s13, 32 }
  0xd0   : > { %3758 = vmatprep.subr.bf16.mxu1 %v4592_v1  ;;  %s5102_s4 = scalar_lea.hbm %s5214_s3, %s3606_s25  ;;  %p4496_p10 = scmp.lt.s32.totalorder %s5104_s18, %s4494_s13 }
  0xd1   : > { %847 = vmatpush1.bf16.msra.mxu0 %v4011_v13  ;;  %p4492_p6 = pneg %p4491_p1  ;;  %p4497_p7 = scmp.lt.s32.totalorder %s4495_s30, %s4489_s26 }
  0xd2   : > { %848 = vmatprep.subr.bf16.mxu0 %v4012_v14  ;;  %v4036_v14 = vld [vmem:[#allocation10] sm:$0xff]  }
  0xd3   : > { %3759 = vmatpush3.bf16.msra.mxu1 %v4025_v21  ;;  %p4498_p3 = por %p4497_p7, %p4496_p10 }
  0xd4   : > { %3760 = vmatprep.subr.bf16.mxu1 %v4592_v1 }
  0xd5   : > { %849 = vmatpush1.bf16.msra.mxu0 %v4014_v15  ;;  %p4499_p11 = pnand %p4498_p3, %p4492_p6 }
  0xd6   : > { %850 = vmatprep.subr.bf16.mxu0 %v4015_v17 }
  0xd7   : > { %3761 = vmatpush3.bf16.msra.mxu1 %v4026_v24 }
  0xd8   : > { %3762 = vmatprep.subr.bf16.mxu1 %v4592_v1 }
  0xd9   : > { %851 = vmatpush1.bf16.msra.mxu0 %v4017_v19 }
  0xda   : > { %852 = vmatprep.subr.bf16.mxu0 %v4018_v20  ;;  %v3410_v20 = vld [vmem:[%s5150_s5] ss:$0 sm:$0xff] }
  0xdb   : > { %3763 = vmatpush3.bf16.msra.mxu1 %v4027_v26 }
  0xdc   : > { %3764 = vmatprep.subr.bf16.mxu1 %v4592_v1 }
  0xdd   : > { %853 = vmatpush1.bf16.msra.mxu0 %v4020_v22 }
  0xde   : > { %3782 = vmatprep.subr.bf16.mxu0 %v4592_v1 }
  0xdf   : > { %3765 = vmatpush3.bf16.msra.mxu1 %v4028_v27 }
  0xe0   : > { %871 = vmatmul.mubr.bf16.vlgmr.msra.gmra.mxu0 %v660_v25  ;;  %3770 = vmatprep.subr.bf16.mxu1 %v4592_v1 }
  0xe1   : > { %3798 = vmatprep.mubr.msk.bf16.mxu0 %vm4593_vm0, %v4592_v1  ;;  %3783 = vmatpush3.bf16.msra.mxu0 %v4029_v3  ;;  %v4084_v3 = vld [vmem:[#allocation11 + $0xc] ss:$16 sps:$4 sm:$0xff]  }
  0xe2   : > { %3767 = vmatmul.mubr.bf16.vlgmr.msra.gmra.mxu1 %v660_v25  ;;  %3784 = vmatprep.subr.bf16.mxu0 %v4592_v1 }
  0xe3   : > { %3772 = vmatprep.mubr.msk.bf16.mxu1 %vm4593_vm0, %v4592_v1 }
  0xe5   : > { %3785 = vmatpush3.bf16.msra.mxu0 %v4030_v4  ;;  %v4079_v4 = vld [vmem:[#allocation11] ss:$16 sps:$4 sm:$0xff]  }
  0xe6   : > { %3786 = vmatprep.subr.bf16.mxu0 %v4592_v1 }
  0xe9   : > { %3787 = vmatpush3.bf16.msra.mxu0 %v4031_v5  ;;  %v4082_v5 = vld [vmem:[#allocation11 + $0x8] ss:$16 sps:$4 sm:$0xff]  }
  0xea   : > { %3788 = vmatprep.subr.bf16.mxu0 %v4592_v1 }
  0xed   : > { %3789 = vmatpush3.bf16.msra.mxu0 %v4032_v6 }
  0xee   : > { %3790 = vmatprep.subr.bf16.mxu0 %v4592_v1 }
  0xf1   : > { %3791 = vmatpush3.bf16.msra.mxu0 %v4033_v7 }
  0xf2   : > { %3792 = vmatprep.subr.bf16.mxu0 %v4592_v1 }
  0xf5   : > { %3793 = vmatpush3.bf16.msra.mxu0 %v4034_v8 }
  0xf6   : > { %3794 = vmatprep.subr.bf16.mxu0 %v4592_v1 }
  0xf9   : > { %3795 = vmatpush3.bf16.msra.mxu0 %v4035_v9 }
  0xfa   : > { %3796 = vmatprep.subr.bf16.mxu0 %v4592_v1 }
  0xfd   : > { %3797 = vmatpush3.bf16.msra.mxu0 %v4036_v14 }
 0x1a0   : > { %v872_v34 = vpop.f32.mrf.mxu0 }
 0x1a1   : > { %v873_v43 = vadd.f32 %v872_v34, %v698_v38  ;;  %v4042_v34 = vld [vmem:[#allocation11 + $0xec] ss:$16 sps:$4 sm:$0xff]   ;;  %v4043_v38 = vld [vmem:[#allocation11 + $0xc0] ss:$16 sps:$4 sm:$0xff]  }
 0x1a2   : > { %v874_v35 = vpop.f32.mrf.mxu0  ;;  %v913_v44 = vpop.f32.mrf.mxu1  ;;  %1427 = vmatprep.subr.bf16.mxu0 %v4042_v34  ;;  %v4099_v34 = vld [vmem:[#allocation13 + $0x20] sm:$0xff]  }
 0x1a3   : > { %v875_v36 = vadd.f32 %v874_v35, %v702_v32  ;;  %v914_v45 = vadd.f32 %v913_v44, %v706_v42  ;;  %v919_v46 = vpack.c.bf16 %v873_v43, %v873_v43  ;;  %v4040_v32 = vld [vmem:[#allocation11 + $0xe8] ss:$16 sps:$4 sm:$0xff]   ;;  %v4045_v35 = vld [vmem:[#allocation11 + $0xc4] ss:$16 sps:$4 sm:$0xff]   ;;  %v4054_v44 = vld [vmem:[#allocation11 + $0xac] ss:$16 sps:$4 sm:$0xff]  }
 0x1a4   : > { %v876_v39 = vpop.f32.mrf.mxu0  ;;  %v3768_v47 = vpop.f32.mrf.mxu1  ;;  %v4051_v43 = vld [vmem:[#allocation11 + $0xa4] ss:$16 sps:$4 sm:$0xff]  }
 0x1a5   : > { %v920_v40 = vpack.c.bf16 %v875_v36, %v875_v36  ;;  %v982_v48 = vpack.c.bf16 %v914_v45, %v914_v45  ;;  %v4048_v36 = vld [vmem:[#allocation11 + $0xcc] ss:$16 sps:$4 sm:$0xff]   ;;  %v4046_v39 = vld [vmem:[#allocation11 + $0xc8] ss:$16 sps:$4 sm:$0xff]   ;;  %v4049_v45 = vld [vmem:[#allocation11 + $0xa0] ss:$16 sps:$4 sm:$0xff]  }
 0x1a6   : > { %v877_v41 = vpop.f32.mrf.mxu0  ;;  %v916_v49 = vpop.f32.mrf.mxu1  ;;  %v4055_v47 = vld [vmem:[#allocation11 + $0x80] ss:$16 sps:$4 sm:$0xff]  }
 0x1a7   : > { %3771 = vmatpush3.bf16.xpose.msra.mxu1 %v920_v40  ;;  %v988_v50 = vsel %vm986_vm1, %v982_v48, 0  ;;  %v4057_v48 = vld [vmem:[#allocation11 + $0x84] ss:$16 sps:$4 sm:$0xff]   ;;  %v4058_v49 = vld [vmem:[#allocation11 + $0x88] ss:$16 sps:$4 sm:$0xff]  }
 0x1a8   : > { %3776 = vmatprep.subr.bf16.mxu1 %v4592_v1  ;;  %v3769_v51 = vpop.f32.mrf.mxu1 }
 0x1a9   : > { %v4063_v51 = vld [vmem:[#allocation11 + $0x64] ss:$16 sps:$4 sm:$0xff]  }
 0x1ae   : > { %3773 = vmatmul.mubr.bf16.vlgmr.msra.gmra.mxu1 %v919_v46  ;;  %v4052_v46 = vld [vmem:[#allocation11 + $0xa8] ss:$16 sps:$4 sm:$0xff]  }
 0x1af   : > { %3778 = vmatprep.mubr.msk.bf16.mxu1 %vm4593_vm0, %v4592_v1  ;;  %3777 = vmatpush3.bf16.msra.mxu1 %v988_v50  ;;  %v4060_v50 = vld [vmem:[#allocation11 + $0x8c] ss:$16 sps:$4 sm:$0xff]  }
 0x1b0   : > { %1386 = vmatprep.subr.bf16.mxu1 %v4039_v31  ;;  %v4097_v31 = vld [vmem:[#allocation13 + $0x60] sm:$0xff]  }
 0x26e   : > { %v955_v52 = vpop.f32.mrf.mxu1 }
 0x26f   : > { %v961_v54 = vmul.f32 0.088388346, %v955_v52  ;;  %v4066_v52 = vld [vmem:[#allocation11 + $0x6c] ss:$16 sps:$4 sm:$0xff]  }
 0x270   : > { %v3774_v55 = vpop.f32.mrf.mxu1 }
 0x271   : > { %v968_v56 = vadd.f32 %v4963_v53, %v961_v54  ;;  %v4061_v54 = vld [vmem:[#allocation11 + $0x60] ss:$16 sps:$4 sm:$0xff]   ;;  %v4064_v55 = vld [vmem:[#allocation11 + $0x68] ss:$16 sps:$4 sm:$0xff]  }
 0x272   : > { %v958_v57 = vpop.f32.mrf.mxu1 }
 0x273   : > { %v970_v58 = vsel %vm969_vm2, %v968_v56, -inf  ;;  %v4072_v57 = vld [vmem:[#allocation11 + $0x4c] ss:$16 sps:$4 sm:$0xff]  }
 0x274   : > { %971 = vmax.xlane.f32.xlu0 %v970_v58  ;;  %v3775_v59 = vpop.f32.mrf.mxu1  ;;  %v4067_v58 = vld [vmem:[#allocation11 + $0x40] ss:$16 sps:$4 sm:$0xff]  }
 0x275   : > { %v4070_v59 = vld [vmem:[#allocation11 + $0x48] ss:$16 sps:$4 sm:$0xff]  }
 0x2fd   : > { %v972_v60 = vpop.xlane.xlu0 %971 }
 0x2fe   : > { %v973_v61 = vsub.f32 %v968_v56, %v972_v60  ;;  %v4069_v56 = vld [vmem:[#allocation11 + $0x44] ss:$16 sps:$4 sm:$0xff]  }
 0x2ff   : > { %v4075_v60 = vld [vmem:[#allocation11 + $0x24] ss:$16 sps:$4 sm:$0xff]  }
 0x300   : > { %v974_v62 = vmul.f32 1.442695, %v973_v61  ;;  %v4078_v61 = vld [vmem:[#allocation11 + $0x2c] ss:$16 sps:$4 sm:$0xff]  }
 0x302   : > { %4245 = vpow2.f32 %v974_v62  ;;  %v4073_v62 = vld [vmem:[#allocation11 + $0x20] ss:$16 sps:$4 sm:$0xff]  }
 0x30f   : > { %v4246_v63 = vpop.eup %4245 }
 0x310   : > { %v976_v2 = vsel %vm969_vm2, %v4246_v63, 0.0 }
 0x311   : > { %977 = vadd.xlane.f32.xlu0 %v976_v2  ;;  %v4081_v2 = vld [vmem:[#allocation11 + $0x4] ss:$16 sps:$4 sm:$0xff]  }
 0x39a   : > { %v978_v10 = vpop.xlane.xlu0 %977 }
 0x39b   : > { %4247 = vrcp.f32 %v978_v10  ;;  %v3419_v10 = vld [vmem:[%s5151_s6] ss:$0 sm:$0xff] }
 0x3a8   : > { %v4248_v11 = vpop.eup %4247 }
 0x3a9   : > { %v980_v12 = vmul.f32 %v4248_v11, %v4246_v63  ;;  %v4076_v63 = vld [vmem:[#allocation11 + $0x28] ss:$16 sps:$4 sm:$0xff]  }
 0x3ab   : > { %v981_v13 = vpack.c.bf16 %v980_v12, %v980_v12  ;;  %v3420_v12 = vld [vmem:[%s5152_s7] ss:$0 sm:$0xff] }
 0x3ad   : > { %3779 = vmatmul.mubr.msk.bf16.vlgmr.msra.gmra.mxu1 %vm969_vm2, %v981_v13 }
 0x3ae   : > { %1418 = vmatprep.mubr.bf16.mxu1 %v4591_v0  ;;  %1387 = vmatpush1.bf16.msra.mxu1 %v4037_v28  ;;  %v4096_v28 = vld [vmem:[#allocation13 + $0xa8] sm:$0xff]  }
 0x3af   : > { %1388 = vmatprep.subr.bf16.mxu1 %v4045_v35  ;;  %v4100_v35 = vld [vmem:[#allocation13 + $0xa0] sm:$0xff]  }
 0x3b2   : > { %1389 = vmatpush1.bf16.msra.mxu1 %v4043_v38  ;;  %v4102_v38 = vld [vmem:[#allocation13 + $0xd8] sm:$0xff]  }
 0x3b3   : > { %1390 = vmatprep.subr.bf16.mxu1 %v4051_v43  ;;  %v4108_v43 = vld [vmem:[#allocation13 + $0x90] sm:$0xff]  }
 0x3b6   : > { %1391 = vmatpush1.bf16.msra.mxu1 %v4049_v45  ;;  %v4110_v45 = vld [vmem:[#allocation13 + $0xc8] sm:$0xff]  }
 0x3b7   : > { %1392 = vmatprep.subr.bf16.mxu1 %v4057_v48  ;;  %v4113_v48 = vld [vmem:[#allocation13 + $0x40] sm:$0xff]  }
 0x3ba   : > { %1393 = vmatpush1.bf16.msra.mxu1 %v4055_v47  ;;  %v4112_v47 = vld [vmem:[#allocation13 + $0x88] sm:$0xff]  }
 0x3bb   : > { %1394 = vmatprep.subr.bf16.mxu1 %v4063_v51  ;;  %v4116_v51 = vld [vmem:[#allocation13 + $0x80] sm:$0xff]  }
 0x3be   : > { %1395 = vmatpush1.bf16.msra.mxu1 %v4061_v54  ;;  %v1220_v54 = vsub.s32 3, %v4943_v29 }
 0x3bf   : > { %1396 = vmatprep.subr.bf16.mxu1 %v4069_v56 }
 0x3c2   : > { %1397 = vmatpush1.bf16.msra.mxu1 %v4067_v58 }
 0x3c3   : > { %1398 = vmatprep.subr.bf16.mxu1 %v4075_v60 }
 0x3c6   : > { %1399 = vmatpush1.bf16.msra.mxu1 %v4073_v62 }
 0x3c7   : > { %1400 = vmatprep.subr.bf16.mxu1 %v4081_v2 }
 0x3ca   : > { %1401 = vmatpush1.bf16.msra.mxu1 %v4079_v4 }
 0x46d   : > { %v1024_v15 = vpop.f32.mrf.mxu1 }
 0x46e   : > { %v1030_v16 = vpack.c.bf16 %v1024_v15, %v1024_v15 }
 0x46f   : > { %v3780_v17 = vpop.f32.mrf.mxu1 }
 0x470   : > { %3799 = vmatmul.mubr.bf16.vlgmr.msra.gmra.mxu0 %v1030_v16  ;;  %v4085_v16 = vld [vmem:[#allocation13 + $0x78] sm:$0xff]  }
 0x471   : > { %v1027_v18 = vpop.f32.mrf.mxu1  ;;  %1459 = vmatprep.mubr.bf16.mxu0 %v4591_v0  ;;  %1428 = vmatpush1.bf16.msra.mxu0 %v4040_v32  ;;  %v4086_v17 = vld [vmem:[#allocation13 + $0xf8] sm:$0xff]   ;;  %v4098_v32 = vld [vmem:[#allocation13 + $0xe0] sm:$0xff]  }
 0x472   : > { %1429 = vmatprep.subr.bf16.mxu0 %v4048_v36  ;;  %v4087_v18 = vld [vmem:[#allocation13 + $0x38] sm:$0xff]   ;;  %3631 = vmatprep.subr.bf16.mxu1 %v4085_v16 }
 0x473   : > { %v3781_v19 = vpop.f32.mrf.mxu1  ;;  %v4101_v36 = vld [vmem:[#allocation13 + $0x58] sm:$0xff]  }
 0x474   : > { %v4088_v19 = vld [vmem:[#allocation13 + $0xb8] sm:$0xff]  }
 0x475   : > { %1430 = vmatpush1.bf16.msra.mxu0 %v4046_v39  ;;  %v4103_v39 = vld [vmem:[#allocation13 + $0x18] sm:$0xff]  }
 0x476   : > { %1431 = vmatprep.subr.bf16.mxu0 %v4054_v44  ;;  %v4109_v44 = vld [vmem:[#allocation13 + $0x48] sm:$0xff]  }
 0x479   : > { %1432 = vmatpush1.bf16.msra.mxu0 %v4052_v46  ;;  %v4111_v46 = vld [vmem:[#allocation13 + $0x8] sm:$0xff]  }
 0x47a   : > { %1433 = vmatprep.subr.bf16.mxu0 %v4060_v50  ;;  %v4115_v50 = vld [vmem:[#allocation13] sm:$0xff]  }
 0x47d   : > { %1434 = vmatpush1.bf16.msra.mxu0 %v4058_v49  ;;  %v4114_v49 = vld [vmem:[#allocation13 + $0xc0] sm:$0xff]  }
 0x47e   : > { %1435 = vmatprep.subr.bf16.mxu0 %v4066_v52  ;;  %v1204_v52 = vld [vmem:[%s5154_s9] sm:$0xf] }
 0x47f   : > { %v1217_v56 = vrot.slane %v1204_v52, %v4953_v37  ;;  %v1221_v58 = vrot.slane %v1204_v52, %v1220_v54 }
 0x481   : > { %1436 = vmatpush1.bf16.msra.mxu0 %v4064_v55  ;;  %v1209_v55 = vrot.slane %v1204_v52, %v4950_v33 }
 0x482   : > { %1437 = vmatprep.subr.bf16.mxu0 %v4072_v57  ;;  %v1213_v57 = vrot.slane %v1204_v52, %v4946_v30 }
 0x485   : > { %1438 = vmatpush1.bf16.msra.mxu0 %v4070_v59 }
 0x486   : > { %1439 = vmatprep.subr.bf16.mxu0 %v4078_v61 }
 0x489   : > { %1440 = vmatpush1.bf16.msra.mxu0 %v4076_v63 }
 0x48a   : > { %1441 = vmatprep.subr.bf16.mxu0 %v4084_v3 }
 0x48d   : > { %1442 = vmatpush1.bf16.msra.mxu0 %v4082_v5 }
 0x48e   : > { %3653 = vmatprep.subr.bf16.mxu0 %v4086_v17 }
 0x530   : > { %v1136_v21 = vpop.f32.mrf.mxu0 }
 0x531   : > { %v1137_v22 = vadd.f32 %v3410_v20, %v1136_v21  ;;  %v4089_v20 = vld [vmem:[#allocation13 + $0x70] sm:$0xff]  }
 0x532   : > { %v3800_v24 = vpop.f32.mrf.mxu0  ;;  %v4090_v21 = vld [vmem:[#allocation13 + $0xf0] sm:$0xff]  }
 0x533   : > { %v1142_v25 = vadd.f32 %v1137_v22, %v4929_v23  ;;  %v4091_v22 = vld [vmem:[#allocation13 + $0x30] sm:$0xff]  }
 0x534   : > { %v1139_v26 = vpop.f32.mrf.mxu0  ;;  %v4092_v24 = vld [vmem:[#allocation13 + $0xb0] sm:$0xff]  }
 0x535   : > { %1145 = vadd.xlane.f32.xlu1 %v1142_v25  ;;  %v4094_v26 = vld [vmem:[#allocation13 + $0xe8] sm:$0xff]  }
 0x536   : > { %v3801_v27 = vpop.f32.mrf.mxu0 }
 0x537   : > { %v4095_v27 = vld [vmem:[#allocation13 + $0x28] sm:$0xff]  }
 0x5be   : > { %v1146_v23 = vpop.xlane.xlu1 %1145 }
 0x5bf   : > { %v1148_v40 = vmul.f32 0.0078125, %v1146_v23  ;;  %v4104_v23 = vld [vmem:[#allocation13 + $0x98] sm:$0xff]  }
 0x5c1   : > { %v1149_v41 = vsub.f32 %v1142_v25, %v1148_v40  ;;  %v4093_v25 = vld [vmem:[#allocation13 + $0x68] sm:$0xff]   ;;  %v4105_v40 = vld [vmem:[#allocation13 + $0x50] sm:$0xff]  }
 0x5c3   : > { %v1150_v42 = vmul.f32 %v1149_v41, %v1149_v41 }
 0x5c5   : > { %1151 = vadd.xlane.f32.xlu1 %v1150_v42  ;;  %v4107_v42 = vld [vmem:[#allocation13 + $0x10] sm:$0xff]  }
 0x64e   : > { %v1152_v6 = vpop.xlane.xlu1 %1151 }
 0x64f   : > { %v1153_v7 = vmul.f32 0.0078125, %v1152_v6 }
 0x651   : > { %v1154_v8 = vadd.f32 1e-12, %v1153_v7 }
 0x653   : > { %4249 = vrsqrt.f32 %v1154_v8 }
 0x660   : > { %v4250_v9 = vpop.eup %4249 }
 0x661   : > { %v1156_v11 = vmul.f32 %v4250_v9, %v1149_v41  ;;  %v4106_v41 = vld [vmem:[#allocation13 + $0xd0] sm:$0xff]  }
 0x663   : > { %v1163_v13 = vmul.f32 %v3419_v10, %v1156_v11 }
 0x665   : > { %v4988_v14 = vadd.f32 %v3420_v12, %v1163_v13 }
 0x667   : > { %v1171_v15 = vpack.c.bf16 %v4988_v14, %v4988_v14 }
 0x669   : > { %1419 = vmatmul.mubr.bf16.vlgmr.msra.gmra.mxu1 %v1171_v15  ;;  %1460 = vmatmul.mubr.bf16.vlgmr.msra.gmra.mxu0 %v1171_v15 }
 0x66a   : > { %3632 = vmatpush3.bf16.msra.mxu1 %v4087_v18  ;;  %3654 = vmatpush3.bf16.msra.mxu0 %v4088_v19 }
 0x66b   : > { %3633 = vmatprep.subr.bf16.mxu1 %v4089_v20  ;;  %3655 = vmatprep.subr.bf16.mxu0 %v4090_v21 }
 0x66e   : > { %3634 = vmatpush3.bf16.msra.mxu1 %v4091_v22  ;;  %3656 = vmatpush3.bf16.msra.mxu0 %v4092_v24 }
 0x66f   : > { %3635 = vmatprep.subr.bf16.mxu1 %v4093_v25  ;;  %3657 = vmatprep.subr.bf16.mxu0 %v4094_v26 }
 0x672   : > { %3636 = vmatpush3.bf16.msra.mxu1 %v4095_v27  ;;  %3658 = vmatpush3.bf16.msra.mxu0 %v4096_v28 }
 0x673   : > { %3637 = vmatprep.subr.bf16.mxu1 %v4097_v31  ;;  %3659 = vmatprep.subr.bf16.mxu0 %v4098_v32 }
 0x676   : > { %3638 = vmatpush3.bf16.msra.mxu1 %v4099_v34  ;;  %3660 = vmatpush3.bf16.msra.mxu0 %v4100_v35 }
 0x677   : > { %3639 = vmatprep.subr.bf16.mxu1 %v4101_v36  ;;  %3661 = vmatprep.subr.bf16.mxu0 %v4102_v38 }
 0x67a   : > { %3640 = vmatpush3.bf16.msra.mxu1 %v4103_v39  ;;  %3662 = vmatpush3.bf16.msra.mxu0 %v4104_v23 }
 0x67b   : > { %3641 = vmatprep.subr.bf16.mxu1 %v4105_v40  ;;  %3663 = vmatprep.subr.bf16.mxu0 %v4106_v41 }
 0x67e   : > { %3642 = vmatpush3.bf16.msra.mxu1 %v4107_v42  ;;  %3664 = vmatpush3.bf16.msra.mxu0 %v4108_v43 }
 0x67f   : > { %3643 = vmatprep.subr.bf16.mxu1 %v4109_v44  ;;  %3665 = vmatprep.subr.bf16.mxu0 %v4110_v45 }
 0x682   : > { %3644 = vmatpush3.bf16.msra.mxu1 %v4111_v46  ;;  %3666 = vmatpush3.bf16.msra.mxu0 %v4112_v47 }
 0x683   : > { %3645 = vmatprep.subr.bf16.mxu1 %v4113_v48  ;;  %3667 = vmatprep.subr.bf16.mxu0 %v4114_v49 }
 0x686   : > { %3646 = vmatpush3.bf16.msra.mxu1 %v4115_v50  ;;  %3668 = vmatpush3.bf16.msra.mxu0 %v4116_v51 }
 0x687   : > { %3802 = vmatprep.subr.bf16.mxu0 %v4592_v1 }
 0x729   : > { %v1420_v59 = vpop.f32.mrf.mxu1  ;;  %v1461_v60 = vpop.f32.mrf.mxu0 }
 0x72a   : > { %v1421_v61 = vadd.f32 %v1420_v59, %v1209_v55  ;;  %v1462_v62 = vadd.f32 %v1461_v60, %v1217_v56 }
 0x72b   : > { %v1422_v63 = vpop.f32.mrf.mxu1  ;;  %v1463_v2 = vpop.f32.mrf.mxu0 }
 0x72c   : > { %v1472_v3 = vmul.f32 0.044715, %v1421_v61  ;;  %v1474_v4 = vmul.f32 0.044715, %v1462_v62  ;;  %v1423_v5 = vadd.f32 %v1422_v63, %v1213_v57  ;;  %v1464_v6 = vadd.f32 %v1463_v2, %v1221_v58  ;;  %v3453_v58 = vld [vmem:[%s5156_s11] ss:$0 sm:$0xff] }
 0x72d   : > { %v1424_v7 = vpop.f32.mrf.mxu1  ;;  %v1465_v8 = vpop.f32.mrf.mxu0  ;;  %v1468_v39 = vmul.f32 0.5, %v1421_v61  ;;  %v1470_v43 = vmul.f32 0.5, %v1462_v62 }
 0x72e   : > { %v1476_v9 = vmul.f32 %v1472_v3, %v1421_v61  ;;  %v1478_v10 = vmul.f32 %v1474_v4, %v1462_v62  ;;  %v1473_v11 = vmul.f32 0.044715, %v1423_v5  ;;  %v1475_v12 = vmul.f32 0.044715, %v1464_v6  ;;  %v4117_v8 = vld [vmem:[#allocation7 + $0x168] ss:$12 sps:$4 sm:$0xff]  }
 0x72f   : > { %v1425_v13 = vpop.f32.mrf.mxu1  ;;  %v1466_v15 = vpop.f32.mrf.mxu0  ;;  %v1469_v41 = vmul.f32 0.5, %v1423_v5  ;;  %v1471_v44 = vmul.f32 0.5, %v1464_v6 }
 0x730   : > { %v1480_v16 = vmul.f32 %v1476_v9, %v1421_v61  ;;  %v1482_v17 = vmul.f32 %v1478_v10, %v1462_v62  ;;  %v1477_v18 = vmul.f32 %v1473_v11, %v1423_v5  ;;  %v1479_v19 = vmul.f32 %v1475_v12, %v1464_v6  ;;  %v4119_v9 = vld [vmem:[#allocation7 + $0x16c] ss:$12 sps:$4 sm:$0xff]   ;;  %v4120_v10 = vld [vmem:[#allocation7 + $0x170] ss:$12 sps:$4 sm:$0xff]   ;;  %v4123_v11 = vld [vmem:[#allocation7 + $0x154] ss:$12 sps:$4 sm:$0xff]  }
 0x731   : > { %2059 = vmatprep.subr.bf16.mxu1 %v4119_v9  ;;  %v4124_v12 = vld [vmem:[#allocation7 + $0x158] ss:$12 sps:$4 sm:$0xff]   ;;  %v4121_v13 = vld [vmem:[#allocation7 + $0x150] ss:$12 sps:$4 sm:$0xff]  }
 0x732   : > { %v1484_v20 = vadd.f32 %v1480_v16, %v1421_v61  ;;  %v1486_v21 = vadd.f32 %v1482_v17, %v1462_v62  ;;  %v1481_v22 = vmul.f32 %v1477_v18, %v1423_v5  ;;  %v1483_v24 = vmul.f32 %v1479_v19, %v1464_v6  ;;  %v4127_v18 = vld [vmem:[#allocation7 + $0x13c] ss:$12 sps:$4 sm:$0xff]   ;;  %v4125_v19 = vld [vmem:[#allocation7 + $0x138] ss:$12 sps:$4 sm:$0xff]  }
 0x734   : > { %v1488_v25 = vmul.f32 0.7978846, %v1484_v20  ;;  %v1490_v26 = vmul.f32 0.7978846, %v1486_v21  ;;  %v1485_v27 = vadd.f32 %v1481_v22, %v1423_v5  ;;  %v1487_v28 = vadd.f32 %v1483_v24, %v1464_v6  ;;  %v4128_v20 = vld [vmem:[#allocation7 + $0x140] ss:$12 sps:$4 sm:$0xff]  }
 0x735   : > { %v4129_v21 = vld [vmem:[#allocation7 + $0x120] ss:$12 sps:$4 sm:$0xff]   ;;  %v4131_v22 = vld [vmem:[#allocation7 + $0x124] ss:$12 sps:$4 sm:$0xff]   ;;  %v4132_v24 = vld [vmem:[#allocation7 + $0x128] ss:$12 sps:$4 sm:$0xff]  }
 0x736   : > { %v1489_v31 = vmul.f32 0.7978846, %v1485_v27  ;;  %v1491_v32 = vmul.f32 0.7978846, %v1487_v28  ;;  %4251 = vtanh.f32 %v1488_v25  ;;  %v4135_v25 = vld [vmem:[#allocation7 + $0x10c] ss:$12 sps:$4 sm:$0xff]  }
 0x737   : > { %4253 = vtanh.f32 %v1490_v26  ;;  %v4133_v26 = vld [vmem:[#allocation7 + $0x108] ss:$12 sps:$4 sm:$0xff]   ;;  %v4136_v27 = vld [vmem:[#allocation7 + $0x110] ss:$12 sps:$4 sm:$0xff]  }
 0x738   : > { %4255 = vtanh.f32 %v1489_v31  ;;  %v4139_v28 = vld [vmem:[#allocation7 + $0xf4] ss:$12 sps:$4 sm:$0xff]   ;;  %v4137_v31 = vld [vmem:[#allocation7 + $0xf0] ss:$12 sps:$4 sm:$0xff]  }
 0x739   : > { %4257 = vtanh.f32 %v1491_v32  ;;  %v4140_v32 = vld [vmem:[#allocation7 + $0xf8] ss:$12 sps:$4 sm:$0xff]  }
 0x743   : > { %v4252_v34 = vpop.eup %4251 }
 0x744   : > { %v4254_v35 = vpop.eup %4253  ;;  %v1496_v36 = vadd.f32 1.0, %v4252_v34  ;;  %v4143_v34 = vld [vmem:[#allocation7 + $0xdc] ss:$12 sps:$4 sm:$0xff]  }
 0x745   : > { %v4256_v38 = vpop.eup %4255  ;;  %v1498_v23 = vadd.f32 1.0, %v4254_v35  ;;  %v4141_v35 = vld [vmem:[#allocation7 + $0xd8] ss:$12 sps:$4 sm:$0xff]  }
 0x746   : > { %v4258_v40 = vpop.eup %4257  ;;  %v1497_v42 = vadd.f32 1.0, %v4256_v38  ;;  %v1500_v46 = vmul.f32 %v1496_v36, %v1468_v39  ;;  %v4144_v36 = vld [vmem:[#allocation7 + $0xe0] ss:$12 sps:$4 sm:$0xff]   ;;  %v4147_v38 = vld [vmem:[#allocation7 + $0xc4] ss:$12 sps:$4 sm:$0xff]  }
 0x747   : > { %v1499_v45 = vadd.f32 1.0, %v4258_v40  ;;  %v1502_v48 = vmul.f32 %v1498_v23, %v1470_v43  ;;  %v4145_v39 = vld [vmem:[#allocation7 + $0xc0] ss:$12 sps:$4 sm:$0xff]   ;;  %v4148_v23 = vld [vmem:[#allocation7 + $0xc8] ss:$12 sps:$4 sm:$0xff]  }
 0x748   : > { %v1501_v47 = vmul.f32 %v1497_v42, %v1469_v41  ;;  %v1504_v52 = vpack.c.bf16 %v1500_v46, %v1500_v46  ;;  %v3487_v46 = vld [vmem:[%s5212_s8] ss:$0 sm:$0xff] }
 0x749   : > { %v1503_v49 = vmul.f32 %v1499_v45, %v1471_v44  ;;  %v1506_v55 = vpack.c.bf16 %v1502_v48, %v1502_v48  ;;  %v3486_v44 = vld [vmem:[%s5157_s12] ss:$0 sm:$0xff] }
 0x74a   : > { %v1505_v50 = vpack.c.bf16 %v1501_v47, %v1501_v47 }
 0x74b   : > { %v1507_v51 = vpack.c.bf16 %v1503_v49, %v1503_v49 }
 0x74c   : > { %1803 = vmatprep.mubr.bf16.mxu1 %v1505_v50  ;;  %v1914_v50 = vld [vmem:[#allocation8 + $0x3] sm:$0x7] }
 0x74d   : > { %1843 = vmatprep.mubr.bf16.mxu0 %v1507_v51  ;;  %1804 = vmatmul.mubr.bf16.vlgmr.msra.gmra.mxu1 %v1504_v52  ;;  %v1923_v51 = vrot.slane %v1914_v50, %v4946_v30 }
 0x74e   : > { %1844 = vmatmul.mubr.bf16.vlgmr.msra.gmra.mxu0 %v1506_v55  ;;  %2091 = vmatprep.mubr.bf16.mxu1 %v4591_v0 }
 0x74f   : > { %3818 = vmatprep.mubr.msk.bf16.mxu0 %vm4593_vm0, %v4592_v1  ;;  %3803 = vmatpush3.bf16.msra.mxu0 %v4120_v10 }
 0x750   : > { %2060 = vmatpush1.bf16.msra.mxu1 %v4117_v8  ;;  %3804 = vmatprep.subr.bf16.mxu0 %v4592_v1 }
 0x751   : > { %2061 = vmatprep.subr.bf16.mxu1 %v4123_v11 }
 0x753   : > { %3805 = vmatpush3.bf16.msra.mxu0 %v4124_v12 }
 0x754   : > { %2062 = vmatpush1.bf16.msra.mxu1 %v4121_v13  ;;  %3806 = vmatprep.subr.bf16.mxu0 %v4592_v1 }
 0x755   : > { %2063 = vmatprep.subr.bf16.mxu1 %v4127_v18 }
 0x757   : > { %3807 = vmatpush3.bf16.msra.mxu0 %v4128_v20 }
 0x758   : > { %2064 = vmatpush1.bf16.msra.mxu1 %v4125_v19  ;;  %3808 = vmatprep.subr.bf16.mxu0 %v4592_v1 }
 0x759   : > { %2065 = vmatprep.subr.bf16.mxu1 %v4131_v22 }
 0x75b   : > { %3809 = vmatpush3.bf16.msra.mxu0 %v4132_v24 }
 0x75c   : > { %2066 = vmatpush1.bf16.msra.mxu1 %v4129_v21  ;;  %3810 = vmatprep.subr.bf16.mxu0 %v4592_v1 }
 0x75d   : > { %2067 = vmatprep.subr.bf16.mxu1 %v4135_v25  ;;  %v4149_v25 = vld [vmem:[#allocation10 + $0x78] sm:$0xff]  }
 0x75f   : > { %3811 = vmatpush3.bf16.msra.mxu0 %v4136_v27  ;;  %v4151_v27 = vld [vmem:[#allocation10 + $0x68] sm:$0xff]  }
 0x760   : > { %2068 = vmatpush1.bf16.msra.mxu1 %v4133_v26  ;;  %3812 = vmatprep.subr.bf16.mxu0 %v4592_v1 }
 0x761   : > { %2069 = vmatprep.subr.bf16.mxu1 %v4139_v28  ;;  %v4152_v28 = vld [vmem:[#allocation10 + $0x60] sm:$0xff]  }
 0x763   : > { %3813 = vmatpush3.bf16.msra.mxu0 %v4140_v32  ;;  %v4154_v32 = vld [vmem:[#allocation10 + $0x50] sm:$0xff]  }
 0x764   : > { %2070 = vmatpush1.bf16.msra.mxu1 %v4137_v31  ;;  %3814 = vmatprep.subr.bf16.mxu0 %v4592_v1  ;;  %v4153_v31 = vld [vmem:[#allocation10 + $0x58] sm:$0xff]  }
 0x765   : > { %2071 = vmatprep.subr.bf16.mxu1 %v4143_v34  ;;  %v4155_v34 = vld [vmem:[#allocation10 + $0x48] sm:$0xff]  }
 0x767   : > { %3815 = vmatpush3.bf16.msra.mxu0 %v4144_v36 }
 0x768   : > { %2072 = vmatpush1.bf16.msra.mxu1 %v4141_v35  ;;  %3816 = vmatprep.subr.bf16.mxu0 %v4592_v1  ;;  %v4156_v35 = vld [vmem:[#allocation10 + $0x40] sm:$0xff]  }
 0x769   : > { %2073 = vmatprep.subr.bf16.mxu1 %v4147_v38 }
 0x76b   : > { %3817 = vmatpush3.bf16.msra.mxu0 %v4148_v23 }
 0x76c   : > { %2074 = vmatpush1.bf16.msra.mxu1 %v4145_v39 }
 0x76d   : > { %3822 = vmatprep.subr.bf16.mxu1 %v4592_v1 }
 0x80d   : > { %v3647_v56 = vpop.f32.mrf.mxu1 }
 0x80e   : > { %v3669_v57 = vpop.f32.mrf.mxu0 }
 0x80f   : > { %v3648_v59 = vpop.f32.mrf.mxu1 }
 0x810   : > { %v3649_v60 = vadd.f32 %v3648_v59, %v3647_v56  ;;  %v3670_v61 = vpop.f32.mrf.mxu0  ;;  %v1927_v56 = vrot.slane %v1914_v50, %v4953_v37 }
 0x811   : > { %v3650_v62 = vpop.f32.mrf.mxu1  ;;  %v3671_v2 = vadd.f32 %v3670_v61, %v3669_v57 }
 0x812   : > { %v1806_v63 = vadd.f32 %v3649_v60, %v3453_v58  ;;  %v3672_v3 = vpop.f32.mrf.mxu0  ;;  %v1919_v60 = vrot.slane %v1914_v50, %v4950_v33  ;;  %v4159_v50 = vld [vmem:[#allocation11 + $0x1e4] ss:$16 sps:$4 sm:$0xff]  }
 0x813   : > { %v3651_v4 = vpop.f32.mrf.mxu1  ;;  %2604 = vmatprep.subr.bf16.mxu0 %v4159_v50  ;;  %v4218_v50 = vld [vmem:[#allocation13 + $0x1e0] sm:$0xff]  }
 0x814   : > { %v1846_v5 = vadd.f32 %v3671_v2, %v1806_v63  ;;  %v3673_v6 = vpop.f32.mrf.mxu0 }
 0x816   : > { %v1851_v7 = vadd.f32 %v1846_v5, %v4988_v14 }
 0x818   : > { %1854 = vadd.xlane.f32.xlu0 %v1851_v7 }
 0x8a1   : > { %v1855_v15 = vpop.xlane.xlu0 %1854 }
 0x8a2   : > { %v1856_v16 = vmul.f32 0.0078125, %v1855_v15 }
 0x8a4   : > { %v1857_v14 = vsub.f32 %v1851_v7, %v1856_v16 }
 0x8a6   : > { %v1858_v17 = vmul.f32 %v1857_v14, %v1857_v14 }
 0x8a8   : > { %1859 = vadd.xlane.f32.xlu1 %v1858_v17 }
 0x931   : > { %v1860_v40 = vpop.xlane.xlu1 %1859 }
 0x932   : > { %v1861_v41 = vmul.f32 0.0078125, %v1860_v40 }
 0x934   : > { %v1862_v42 = vadd.f32 1e-12, %v1861_v41  ;;  %v3514_v41 = vld [vmem:[%s5150_s5 + $0x1] ss:$0 sm:$0xff] }
 0x936   : > { %4259 = vrsqrt.f32 %v1862_v42 }
 0x943   : > { %v4260_v43 = vpop.eup %4259 }
 0x944   : > { %v1864_v45 = vmul.f32 %v4260_v43, %v1857_v14 }
 0x946   : > { %v1871_v47 = vmul.f32 %v3486_v44, %v1864_v45 }
 0x948   : > { %v5023_v48 = vadd.f32 %v3487_v46, %v1871_v47 }
 0x94a   : > { %v1879_v49 = vpack.c.bf16 %v5023_v48, %v5023_v48 }
 0x94c   : > { %2092 = vmatmul.mubr.bf16.vlgmr.msra.gmra.mxu1 %v1879_v49  ;;  %3819 = vmatmul.mubr.bf16.vlgmr.msra.gmra.mxu0 %v1879_v49  ;;  %v4157_v49 = vld [vmem:[#allocation11 + $0x1e0] ss:$16 sps:$4 sm:$0xff]  }
 0x94d   : > { %3824 = vmatprep.mubr.msk.bf16.mxu1 %vm4593_vm0, %v4592_v1  ;;  %2636 = vmatprep.mubr.bf16.mxu0 %v4591_v0 }
 0x94e   : > { %2605 = vmatpush1.bf16.msra.mxu0 %v4157_v49  ;;  %v4217_v49 = vld [vmem:[#allocation13 + $0x160] sm:$0xff]  }
 0xa0c   : > { %v2093_v52 = vpop.f32.mrf.mxu1  ;;  %v2134_v55 = vpop.f32.mrf.mxu0 }
 0xa0d   : > { %v2135_v2 = vadd.f32 %v2134_v55, %v1927_v56  ;;  %v2094_v5 = vadd.f32 %v2093_v52, %v1919_v60  ;;  %v4162_v52 = vld [vmem:[#allocation11 + $0x1ec] ss:$16 sps:$4 sm:$0xff]   ;;  %v4165_v55 = vld [vmem:[#allocation11 + $0x1c4] ss:$16 sps:$4 sm:$0xff]   ;;  %v4163_v56 = vld [vmem:[#allocation11 + $0x1c0] ss:$16 sps:$4 sm:$0xff]  }
 0xa0e   : > { %v2095_v57 = vpop.f32.mrf.mxu1  ;;  %v3820_v58 = vpop.f32.mrf.mxu0  ;;  %2606 = vmatprep.subr.bf16.mxu0 %v4165_v55  ;;  %v4221_v55 = vld [vmem:[#allocation13 + $0x158] sm:$0xff]  }
 0xa0f   : > { %v2096_v59 = vadd.f32 %v2095_v57, %v1923_v51  ;;  %v2196_v6 = vpack.c.bf16 %v2135_v2, %v2135_v2  ;;  %v2140_v7 = vpack.c.bf16 %v2094_v5, %v2094_v5  ;;  %v4160_v51 = vld [vmem:[#allocation11 + $0x1e8] ss:$16 sps:$4 sm:$0xff]   ;;  %2607 = vmatpush1.bf16.msra.mxu0 %v4163_v56 }
 0xa10   : > { %v2097_v61 = vpop.f32.mrf.mxu1  ;;  %v2137_v62 = vpop.f32.mrf.mxu0  ;;  %v4166_v57 = vld [vmem:[#allocation11 + $0x1c8] ss:$16 sps:$4 sm:$0xff]  }
 0xa11   : > { %v2141_v63 = vpack.c.bf16 %v2096_v59, %v2096_v59  ;;  %v2201_v8 = vsel %vm986_vm1, %v2196_v6, 0  ;;  %v4171_v61 = vld [vmem:[#allocation11 + $0x1a4] ss:$16 sps:$4 sm:$0xff]   ;;  %v4174_v62 = vld [vmem:[#allocation11 + $0x1ac] ss:$16 sps:$4 sm:$0xff]  }
 0xa12   : > { %v2098_v3 = vpop.f32.mrf.mxu1  ;;  %v3821_v4 = vpop.f32.mrf.mxu0  ;;  %v4172_v2 = vld [vmem:[#allocation11 + $0x1a8] ss:$16 sps:$4 sm:$0xff]   ;;  %2608 = vmatprep.subr.bf16.mxu0 %v4171_v61  ;;  %v4180_v6 = vld [vmem:[#allocation11 + $0x18c] ss:$16 sps:$4 sm:$0xff]  }
 0xa13   : > { %3823 = vmatpush3.bf16.xpose.msra.mxu1 %v2141_v63  ;;  %v4169_v63 = vld [vmem:[#allocation11 + $0x1a0] ss:$16 sps:$4 sm:$0xff]   ;;  %v4177_v4 = vld [vmem:[#allocation11 + $0x184] ss:$16 sps:$4 sm:$0xff]   ;;  %v4178_v5 = vld [vmem:[#allocation11 + $0x188] ss:$16 sps:$4 sm:$0xff]  }
 0xa14   : > { %3828 = vmatprep.subr.bf16.mxu1 %v4592_v1  ;;  %2609 = vmatpush1.bf16.msra.mxu0 %v4169_v63  ;;  %v4175_v3 = vld [vmem:[#allocation11 + $0x180] ss:$16 sps:$4 sm:$0xff]   ;;  %v4223_v56 = vld [vmem:[#allocation13 + $0x118] sm:$0xff]   ;;  %v4229_v61 = vld [vmem:[#allocation13 + $0x148] sm:$0xff]  }
 0xa15   : > { %2610 = vmatprep.subr.bf16.mxu0 %v4177_v4  ;;  %v4231_v63 = vld [vmem:[#allocation13 + $0x108] sm:$0xff]   ;;  %v4234_v4 = vld [vmem:[#allocation13 + $0x1c0] sm:$0xff]  }
 0xa18   : > { %2611 = vmatpush1.bf16.msra.mxu0 %v4175_v3  ;;  %v4233_v3 = vld [vmem:[#allocation13 + $0x140] sm:$0xff]  }
 0xa1a   : > { %3825 = vmatmul.mubr.bf16.vlgmr.msra.gmra.mxu1 %v2140_v7  ;;  %v4183_v7 = vld [vmem:[#allocation11 + $0x164] ss:$16 sps:$4 sm:$0xff]  }
 0xa1b   : > { %3829 = vmatpush3.bf16.msra.mxu1 %v2201_v8  ;;  %3830 = vmatprep.mubr.msk.bf16.mxu1 %vm4593_vm0, %v4592_v1  ;;  %v4186_v8 = vld [vmem:[#allocation11 + $0x16c] ss:$16 sps:$4 sm:$0xff]  }
 0xa1c   : > { %3834 = vmatprep.subr.bf16.mxu1 %v4592_v1  ;;  %2612 = vmatprep.subr.bf16.mxu0 %v4183_v7  ;;  %v3527_v7 = vld [vmem:[%s5154_s9 + $0x4] sm:$0xf] }
 0xada   : > { %v2176_v9 = vpop.f32.mrf.mxu1 }
 0xadb   : > { %v2182_v10 = vmul.f32 0.088388346, %v2176_v9  ;;  %v4181_v9 = vld [vmem:[#allocation11 + $0x160] ss:$16 sps:$4 sm:$0xff]  }
 0xadc   : > { %v3826_v11 = vpop.f32.mrf.mxu1  ;;  %2613 = vmatpush1.bf16.msra.mxu0 %v4181_v9  ;;  %v2435_v9 = vrot.slane %v3527_v7, %v4953_v37 }
 0xadd   : > { %v2183_v12 = vadd.f32 %v4963_v53, %v2182_v10  ;;  %v4150_v53 = vld [vmem:[#allocation10 + $0x70] sm:$0xff]   ;;  %v4184_v10 = vld [vmem:[#allocation11 + $0x168] ss:$16 sps:$4 sm:$0xff]  }
 0xade   : > { %v2179_v13 = vpop.f32.mrf.mxu1  ;;  %v4189_v11 = vld [vmem:[#allocation11 + $0x144] ss:$16 sps:$4 sm:$0xff]  }
 0xadf   : > { %v2184_v15 = vsel %vm969_vm2, %v2183_v12, -inf  ;;  %v4187_v13 = vld [vmem:[#allocation11 + $0x140] ss:$16 sps:$4 sm:$0xff]   ;;  %2614 = vmatprep.subr.bf16.mxu0 %v4189_v11  ;;  %v2439_v11 = vrot.slane %v3527_v7, %v1220_v54 }
 0xae0   : > { %2185 = vmax.xlane.f32.xlu0 %v2184_v15  ;;  %v3827_v16 = vpop.f32.mrf.mxu1  ;;  %v4190_v15 = vld [vmem:[#allocation11 + $0x148] ss:$16 sps:$4 sm:$0xff]   ;;  %2615 = vmatpush1.bf16.msra.mxu0 %v4187_v13 }
 0xae1   : > { %v4195_v16 = vld [vmem:[#allocation11 + $0x124] ss:$16 sps:$4 sm:$0xff]  }
 0xae2   : > { %2616 = vmatprep.subr.bf16.mxu0 %v4195_v16 }
 0xb69   : > { %v2186_v14 = vpop.xlane.xlu0 %2185 }
 0xb6a   : > { %v2187_v17 = vsub.f32 %v2183_v12, %v2186_v14  ;;  %v4192_v12 = vld [vmem:[#allocation11 + $0x14c] ss:$16 sps:$4 sm:$0xff]  }
 0xb6b   : > { %v4198_v14 = vld [vmem:[#allocation11 + $0x12c] ss:$16 sps:$4 sm:$0xff]  }
 0xb6c   : > { %v2188_v18 = vmul.f32 1.442695, %v2187_v17  ;;  %v4193_v17 = vld [vmem:[#allocation11 + $0x120] ss:$16 sps:$4 sm:$0xff]  }
 0xb6d   : > { %2617 = vmatpush1.bf16.msra.mxu0 %v4193_v17 }
 0xb6e   : > { %4261 = vpow2.f32 %v2188_v18  ;;  %v4196_v18 = vld [vmem:[#allocation11 + $0x128] ss:$16 sps:$4 sm:$0xff]  }
 0xb7b   : > { %v4262_v19 = vpop.eup %4261 }
 0xb7c   : > { %v2190_v20 = vsel %vm969_vm2, %v4262_v19, 0.0 }
 0xb7d   : > { %2191 = vadd.xlane.f32.xlu1 %v2190_v20  ;;  %v4204_v20 = vld [vmem:[#allocation11 + $0x10c] ss:$16 sps:$4 sm:$0xff]  }
 0xc06   : > { %v2192_v21 = vpop.xlane.xlu1 %2191 }
 0xc07   : > { %4263 = vrcp.f32 %v2192_v21  ;;  %v4199_v21 = vld [vmem:[#allocation11 + $0x100] ss:$16 sps:$4 sm:$0xff]  }
 0xc14   : > { %v4264_v22 = vpop.eup %4263 }
 0xc15   : > { %v2194_v24 = vmul.f32 %v4264_v22, %v4262_v19  ;;  %v4201_v19 = vld [vmem:[#allocation11 + $0x104] ss:$16 sps:$4 sm:$0xff]   ;;  %v4202_v22 = vld [vmem:[#allocation11 + $0x108] ss:$16 sps:$4 sm:$0xff]  }
 0xc16   : > { %2618 = vmatprep.subr.bf16.mxu0 %v4201_v19 }
 0xc17   : > { %v2195_v26 = vpack.c.bf16 %v2194_v24, %v2194_v24  ;;  %2619 = vmatpush1.bf16.msra.mxu0 %v4199_v21 }
 0xc19   : > { %3831 = vmatmul.mubr.msk.bf16.vlgmr.msra.gmra.mxu1 %vm969_vm2, %v2195_v26 }
 0xc1a   : > { %3835 = vmatpush3.bf16.msra.mxu1 %v4149_v25  ;;  %3850 = vmatprep.mubr.msk.bf16.mxu1 %vm4593_vm0, %v4592_v1 }
 0xc1b   : > { %3836 = vmatprep.subr.bf16.mxu1 %v4592_v1 }
 0xc1e   : > { %3837 = vmatpush3.bf16.msra.mxu1 %v4150_v53 }
 0xc1f   : > { %3838 = vmatprep.subr.bf16.mxu1 %v4592_v1 }
 0xc22   : > { %3839 = vmatpush3.bf16.msra.mxu1 %v4151_v27  ;;  %v3525_v27 = vld [vmem:[%s5151_s6 + $0x1] ss:$0 sm:$0xff] }
 0xc23   : > { %3840 = vmatprep.subr.bf16.mxu1 %v4592_v1 }
 0xc26   : > { %3841 = vmatpush3.bf16.msra.mxu1 %v4152_v28 }
 0xc27   : > { %3842 = vmatprep.subr.bf16.mxu1 %v4592_v1 }
 0xc2a   : > { %3843 = vmatpush3.bf16.msra.mxu1 %v4153_v31  ;;  %v3526_v31 = vld [vmem:[%s5152_s7 + $0x1] ss:$0 sm:$0xff] }
 0xc2b   : > { %3844 = vmatprep.subr.bf16.mxu1 %v4592_v1 }
 0xc2e   : > { %3845 = vmatpush3.bf16.msra.mxu1 %v4154_v32 }
 0xc2f   : > { %3846 = vmatprep.subr.bf16.mxu1 %v4592_v1 }
 0xc32   : > { %3847 = vmatpush3.bf16.msra.mxu1 %v4155_v34 }
 0xc33   : > { %3848 = vmatprep.subr.bf16.mxu1 %v4592_v1 }
 0xc36   : > { %3849 = vmatpush3.bf16.msra.mxu1 %v4156_v35 }
 0xc37   : > { %2645 = vmatprep.subr.bf16.mxu1 %v4162_v52  ;;  %v4220_v52 = vld [vmem:[#allocation13 + $0x1a0] sm:$0xff]  }
 0xcd9   : > { %v2237_v36 = vpop.f32.mrf.mxu1 }
 0xcda   : > { %v2243_v38 = vpack.c.bf16 %v2237_v36, %v2237_v36  ;;  %v4205_v36 = vld [vmem:[#allocation13 + $0x178] sm:$0xff]  }
 0xcdb   : > { %v3832_v39 = vpop.f32.mrf.mxu1  ;;  %3697 = vmatprep.subr.bf16.mxu0 %v4205_v36 }
 0xcdc   : > { %3851 = vmatmul.mubr.bf16.vlgmr.msra.gmra.mxu1 %v2243_v38  ;;  %v4206_v38 = vld [vmem:[#allocation13 + $0x1f8] sm:$0xff]  }
 0xcdd   : > { %v2240_v23 = vpop.f32.mrf.mxu1  ;;  %2677 = vmatprep.mubr.bf16.mxu1 %v4591_v0  ;;  %v4168_v0 = vld [vmem:[#allocation11 + $0x1cc] ss:$16 sps:$4 sm:$0xff]   ;;  %2646 = vmatpush1.bf16.msra.mxu1 %v4160_v51  ;;  %v4219_v51 = vld [vmem:[#allocation13 + $0x120] sm:$0xff]  }
 0xcde   : > { %2647 = vmatprep.subr.bf16.mxu1 %v4168_v0  ;;  %v4207_v39 = vld [vmem:[#allocation13 + $0x138] sm:$0xff]  }
 0xcdf   : > { %v3833_v40 = vpop.f32.mrf.mxu1  ;;  %v4208_v23 = vld [vmem:[#allocation13 + $0x1b8] sm:$0xff]  }
 0xce0   : > { %v4209_v40 = vld [vmem:[#allocation13 + $0x170] sm:$0xff]   ;;  %v4222_v0 = vld [vmem:[#allocation13 + $0x1d8] sm:$0xff]  }
 0xce1   : > { %2648 = vmatpush1.bf16.msra.mxu1 %v4166_v57  ;;  %v4224_v57 = vld [vmem:[#allocation13 + $0x198] sm:$0xff]  }
 0xce2   : > { %2649 = vmatprep.subr.bf16.mxu1 %v4174_v62  ;;  %v4230_v62 = vld [vmem:[#allocation13 + $0x1c8] sm:$0xff]  }
 0xce5   : > { %2650 = vmatpush1.bf16.msra.mxu1 %v4172_v2  ;;  %v4232_v2 = vld [vmem:[#allocation13 + $0x188] sm:$0xff]  }
 0xce6   : > { %2651 = vmatprep.subr.bf16.mxu1 %v4180_v6  ;;  %v4236_v6 = vld [vmem:[#allocation13 + $0x180] sm:$0xff]  }
 0xce9   : > { %2652 = vmatpush1.bf16.msra.mxu1 %v4178_v5  ;;  %v4235_v5 = vld [vmem:[#allocation13 + $0x100] sm:$0xff]  }
 0xcea   : > { %2653 = vmatprep.subr.bf16.mxu1 %v4186_v8  ;;  %v2427_v8 = vrot.slane %v3527_v7, %v4950_v33 }
 0xced   : > { %2654 = vmatpush1.bf16.msra.mxu1 %v4184_v10  ;;  %v2431_v10 = vrot.slane %v3527_v7, %v4946_v30 }
 0xcee   : > { %2655 = vmatprep.subr.bf16.mxu1 %v4192_v12 }
 0xcf1   : > { %2656 = vmatpush1.bf16.msra.mxu1 %v4190_v15 }
 0xcf2   : > { %2657 = vmatprep.subr.bf16.mxu1 %v4198_v14 }
 0xcf5   : > { %2658 = vmatpush1.bf16.msra.mxu1 %v4196_v18 }
 0xcf6   : > { %2659 = vmatprep.subr.bf16.mxu1 %v4204_v20 }
 0xcf9   : > { %2660 = vmatpush1.bf16.msra.mxu1 %v4202_v22 }
 0xcfa   : > { %3719 = vmatprep.subr.bf16.mxu1 %v4206_v38 }
 0xd9c   : > { %v2351_v42 = vpop.f32.mrf.mxu1 }
 0xd9d   : > { %v2352_v43 = vadd.f32 %v3514_v41, %v2351_v42  ;;  %v4210_v41 = vld [vmem:[#allocation13 + $0x1f0] sm:$0xff]  }
 0xd9e   : > { %v3852_v44 = vpop.f32.mrf.mxu1  ;;  %v4211_v42 = vld [vmem:[#allocation13 + $0x130] sm:$0xff]  }
 0xd9f   : > { %v2357_v45 = vadd.f32 %v2352_v43, %v5023_v48  ;;  %v4212_v43 = vld [vmem:[#allocation13 + $0x1b0] sm:$0xff]   ;;  %v4213_v44 = vld [vmem:[#allocation13 + $0x168] sm:$0xff]  }
 0xda0   : > { %v2354_v46 = vpop.f32.mrf.mxu1 }
 0xda1   : > { %2362 = vadd.xlane.f32.xlu0 %v2357_v45  ;;  %v4215_v46 = vld [vmem:[#allocation13 + $0x128] sm:$0xff]  }
 0xda2   : > { %v3853_v47 = vpop.f32.mrf.mxu1 }
 0xda3   : > { %v4216_v47 = vld [vmem:[#allocation13 + $0x1a8] sm:$0xff]  }
 0xe2a   : > { %v2363_v48 = vpop.xlane.xlu0 %2362 }
 0xe2b   : > { %v2364_v58 = vmul.f32 0.0078125, %v2363_v48  ;;  %v4225_v48 = vld [vmem:[#allocation13 + $0x150] sm:$0xff]  }
 0xe2d   : > { %v2365_v59 = vsub.f32 %v2357_v45, %v2364_v58  ;;  %v4214_v45 = vld [vmem:[#allocation13 + $0x1e8] sm:$0xff]   ;;  %v4226_v58 = vld [vmem:[#allocation13 + $0x1d0] sm:$0xff]  }
 0xe2f   : > { %v2366_v60 = vmul.f32 %v2365_v59, %v2365_v59 }
 0xe31   : > { %2367 = vadd.xlane.f32.xlu1 %v2366_v60  ;;  %v4228_v60 = vld [vmem:[#allocation13 + $0x190] sm:$0xff]  }
 0xeba   : > { %v2368_v24 = vpop.xlane.xlu1 %2367 }
 0xebb   : > { %v2369_v25 = vmul.f32 0.0078125, %v2368_v24 }
 0xebd   : > { %v2370_v26 = vadd.f32 1e-12, %v2369_v25 }
 0xebf   : > { %4265 = vrsqrt.f32 %v2370_v26 }
 0xecc   : > { %v4266_v53 = vpop.eup %4265 }
 0xecd   : > { %v2372_v28 = vmul.f32 %v4266_v53, %v2365_v59  ;;  %v4227_v59 = vld [vmem:[#allocation13 + $0x110] sm:$0xff]  }
 0xecf   : > { %v2379_v32 = vmul.f32 %v3525_v27, %v2372_v28 }
 0xed1   : > { %v5062_v34 = vadd.f32 %v3526_v31, %v2379_v32 }
 0xed3   : > { %v2387_v35 = vpack.c.bf16 %v5062_v34, %v5062_v34 }
 0xed5   : > { %2637 = vmatmul.mubr.bf16.vlgmr.msra.gmra.mxu0 %v2387_v35  ;;  %2678 = vmatmul.mubr.bf16.vlgmr.msra.gmra.mxu1 %v2387_v35 }
 0xed6   : > { %3698 = vmatpush3.bf16.msra.mxu0 %v4207_v39  ;;  %3720 = vmatpush3.bf16.msra.mxu1 %v4208_v23 }
 0xed7   : > { %3699 = vmatprep.subr.bf16.mxu0 %v4209_v40  ;;  %3721 = vmatprep.subr.bf16.mxu1 %v4210_v41 }
 0xeda   : > { %3700 = vmatpush3.bf16.msra.mxu0 %v4211_v42  ;;  %3722 = vmatpush3.bf16.msra.mxu1 %v4212_v43 }
 0xedb   : > { %3701 = vmatprep.subr.bf16.mxu0 %v4213_v44  ;;  %3723 = vmatprep.subr.bf16.mxu1 %v4214_v45 }
 0xede   : > { %3702 = vmatpush3.bf16.msra.mxu0 %v4215_v46  ;;  %3724 = vmatpush3.bf16.msra.mxu1 %v4216_v47 }
 0xedf   : > { %3703 = vmatprep.subr.bf16.mxu0 %v4217_v49  ;;  %3725 = vmatprep.subr.bf16.mxu1 %v4218_v50 }
 0xee2   : > { %3704 = vmatpush3.bf16.msra.mxu0 %v4219_v51  ;;  %3726 = vmatpush3.bf16.msra.mxu1 %v4220_v52 }
 0xee3   : > { %3705 = vmatprep.subr.bf16.mxu0 %v4221_v55  ;;  %3727 = vmatprep.subr.bf16.mxu1 %v4222_v0 }
 0xee6   : > { %3706 = vmatpush3.bf16.msra.mxu0 %v4223_v56  ;;  %3728 = vmatpush3.bf16.msra.mxu1 %v4224_v57 }
 0xee7   : > { %3707 = vmatprep.subr.bf16.mxu0 %v4225_v48  ;;  %3729 = vmatprep.subr.bf16.mxu1 %v4226_v58 }
 0xeea   : > { %3708 = vmatpush3.bf16.msra.mxu0 %v4227_v59  ;;  %3730 = vmatpush3.bf16.msra.mxu1 %v4228_v60 }
 0xeeb   : > { %3709 = vmatprep.subr.bf16.mxu0 %v4229_v61  ;;  %3731 = vmatprep.subr.bf16.mxu1 %v4230_v62 }
 0xeee   : > { %3710 = vmatpush3.bf16.msra.mxu0 %v4231_v63  ;;  %3732 = vmatpush3.bf16.msra.mxu1 %v4232_v2 }
 0xeef   : > { %3711 = vmatprep.subr.bf16.mxu0 %v4233_v3  ;;  %3733 = vmatprep.subr.bf16.mxu1 %v4234_v4  ;;  %v3561_v4 = vld [vmem:[%s5156_s11 + $0x1] ss:$0 sm:$0xff] }
 0xef2   : > { %3712 = vmatpush3.bf16.msra.mxu0 %v4235_v5  ;;  %3734 = vmatpush3.bf16.msra.mxu1 %v4236_v6 }
 0xef3   : > { %3854 = vmatprep.subr.bf16.mxu0 %v4592_v1 }
 0xf95   : > { %v2638_v12 = vpop.f32.mrf.mxu0  ;;  %v2679_v13 = vpop.f32.mrf.mxu1 }
 0xf96   : > { %v2639_v15 = vadd.f32 %v2638_v12, %v2427_v8  ;;  %v2680_v16 = vadd.f32 %v2679_v13, %v2435_v9 }
 0xf97   : > { %v2640_v14 = vpop.f32.mrf.mxu0  ;;  %v2681_v17 = vpop.f32.mrf.mxu1 }
 0xf98   : > { %v2690_v18 = vmul.f32 0.044715, %v2639_v15  ;;  %v2692_v19 = vmul.f32 0.044715, %v2680_v16  ;;  %v2641_v20 = vadd.f32 %v2640_v14, %v2431_v10  ;;  %v2682_v21 = vadd.f32 %v2681_v17, %v2439_v11  ;;  %v4237_v14 = vld [vmem:[#allocation14 + $0x38] sm:$0xff]   ;;  %v4238_v17 = vld [vmem:[#allocation14 + $0x30] sm:$0xff]  }
 0xf99   : > { %v2642_v22 = vpop.f32.mrf.mxu0  ;;  %v2683_v24 = vpop.f32.mrf.mxu1  ;;  %v2686_v47 = vmul.f32 0.5, %v2639_v15  ;;  %v2688_v55 = vmul.f32 0.5, %v2680_v16 }
 0xf9a   : > { %v2694_v33 = vmul.f32 %v2690_v18, %v2639_v15  ;;  %v2696_v25 = vmul.f32 %v2692_v19, %v2680_v16  ;;  %v2691_v37 = vmul.f32 0.044715, %v2641_v20  ;;  %v2693_v26 = vmul.f32 0.044715, %v2682_v21  ;;  %v4239_v22 = vld [vmem:[#allocation14 + $0x28] sm:$0xff]   ;;  %v4240_v24 = vld [vmem:[#allocation14 + $0x20] sm:$0xff]  }
 0xf9b   : > { %v2643_v30 = vpop.f32.mrf.mxu0  ;;  %v2684_v53 = vpop.f32.mrf.mxu1  ;;  %v2687_v51 = vmul.f32 0.5, %v2641_v20  ;;  %v2689_v0 = vmul.f32 0.5, %v2682_v21 }
 0xf9c   : > { %v2698_v29 = vmul.f32 %v2694_v33, %v2639_v15  ;;  %v2700_v54 = vmul.f32 %v2696_v25, %v2680_v16  ;;  %v2695_v27 = vmul.f32 %v2691_v37, %v2641_v20  ;;  %v2697_v28 = vmul.f32 %v2693_v26, %v2682_v21  ;;  %v4242_v33 = vld [vmem:[#allocation14 + $0x10] sm:$0xff]   ;;  %v4243_v25 = vld [vmem:[#allocation14 + $0x8] sm:$0xff]   ;;  %v4244_v37 = vld [vmem:[#allocation14] sm:$0xff]  }
 0xf9e   : > { %v2702_v31 = vadd.f32 %v2698_v29, %v2639_v15  ;;  %v2704_v32 = vadd.f32 %v2700_v54, %v2680_v16  ;;  %v2699_v35 = vmul.f32 %v2695_v27, %v2641_v20  ;;  %v2701_v36 = vmul.f32 %v2697_v28, %v2682_v21  ;;  %v3596_v54 = vld [vmem:[%s5157_s12 + $0x1] ss:$0 sm:$0xff] }
 0xf9f   : > { %v3597_v28 = vld [vmem:[%s5212_s8 + $0x1] ss:$0 sm:$0xff] }
 0xfa0   : > { %v2706_v38 = vmul.f32 0.7978846, %v2702_v31  ;;  %v2708_v39 = vmul.f32 0.7978846, %v2704_v32  ;;  %v2703_v23 = vadd.f32 %v2699_v35, %v2641_v20  ;;  %v2705_v40 = vadd.f32 %v2701_v36, %v2682_v21  ;;  %v3118_v35 = vld [vmem:[%s5213_s28] sm:$0x1] }
 0xfa2   : > { %v2707_v41 = vmul.f32 0.7978846, %v2703_v23  ;;  %v2709_v42 = vmul.f32 0.7978846, %v2705_v40  ;;  %4267 = vtanh.f32 %v2706_v38 }
 0xfa3   : > { %4269 = vtanh.f32 %v2708_v39 }
 0xfa4   : > { %4271 = vtanh.f32 %v2707_v41 }
 0xfa5   : > { %4273 = vtanh.f32 %v2709_v42 }
 0xfaf   : > { %v4268_v43 = vpop.eup %4267 }
 0xfb0   : > { %v4270_v44 = vpop.eup %4269  ;;  %v2714_v45 = vadd.f32 1.0, %v4268_v43 }
 0xfb1   : > { %v4272_v46 = vpop.eup %4271  ;;  %v2716_v49 = vadd.f32 1.0, %v4270_v44 }
 0xfb2   : > { %v4274_v50 = vpop.eup %4273  ;;  %v2715_v52 = vadd.f32 1.0, %v4272_v46  ;;  %v2718_v57 = vmul.f32 %v2714_v45, %v2686_v47 }
 0xfb3   : > { %v2717_v56 = vadd.f32 1.0, %v4274_v50  ;;  %v2720_v58 = vmul.f32 %v2716_v49, %v2688_v55 }
 0xfb4   : > { %v2719_v48 = vmul.f32 %v2715_v52, %v2687_v51  ;;  %v2722_v62 = vpack.c.bf16 %v2718_v57, %v2718_v57 }
 0xfb5   : > { %v2721_v59 = vmul.f32 %v2717_v56, %v2689_v0  ;;  %v2724_v63 = vpack.c.bf16 %v2720_v58, %v2720_v58 }
 0xfb6   : > { %v2723_v60 = vpack.c.bf16 %v2719_v48, %v2719_v48 }
 0xfb7   : > { %v2725_v61 = vpack.c.bf16 %v2721_v59, %v2721_v59 }
 0xfb8   : > { %3023 = vmatprep.mubr.bf16.mxu0 %v2723_v60 }
 0xfb9   : > { %3063 = vmatprep.mubr.bf16.mxu1 %v2725_v61  ;;  %3024 = vmatmul.mubr.bf16.vlgmr.msra.gmra.mxu0 %v2722_v62 }
 0xfba   : > { %3064 = vmatmul.mubr.bf16.vlgmr.msra.gmra.mxu1 %v2724_v63  ;;  %3870 = vmatprep.mubr.msk.bf16.mxu0 %vm4593_vm0, %v4592_v1 }
 0xfbb   : > { %3855 = vmatpush3.bf16.msra.mxu0 %v4237_v14 }
 0xfbc   : > { %3856 = vmatprep.subr.bf16.mxu0 %v4592_v1 }
 0xfbf   : > { %3857 = vmatpush3.bf16.msra.mxu0 %v4238_v17 }
 0xfc0   : > { %3858 = vmatprep.subr.bf16.mxu0 %v4592_v1 }
 0xfc3   : > { %3859 = vmatpush3.bf16.msra.mxu0 %v4239_v22 }
 0xfc4   : > { %3860 = vmatprep.subr.bf16.mxu0 %v4592_v1 }
 0xfc7   : > { %3861 = vmatpush3.bf16.msra.mxu0 %v4240_v24 }
 0xfc8   : > { %3862 = vmatprep.subr.bf16.mxu0 %v4592_v1 }
0x1079   : > { %v3713_v2 = vpop.f32.mrf.mxu0 }
0x107a   : > { %v3735_v3 = vpop.f32.mrf.mxu1 }
0x107b   : > { %v3714_v5 = vpop.f32.mrf.mxu0 }
0x107c   : > { %v3715_v6 = vadd.f32 %v3714_v5, %v3713_v2  ;;  %v3736_v7 = vpop.f32.mrf.mxu1 }
0x107d   : > { %v3716_v8 = vpop.f32.mrf.mxu0  ;;  %v3737_v10 = vadd.f32 %v3736_v7, %v3735_v3 }
0x107e   : > { %v3026_v9 = vadd.f32 %v3715_v6, %v3561_v4  ;;  %v3738_v11 = vpop.f32.mrf.mxu1 }
0x107f   : > { %v3717_v12 = vpop.f32.mrf.mxu0 }
0x1080   : > { %v3066_v13 = vadd.f32 %v3737_v10, %v3026_v9  ;;  %v3739_v15 = vpop.f32.mrf.mxu1 }
0x1082   : > { %v3071_v16 = vadd.f32 %v3066_v13, %v5062_v34  ;;  %v4241_v34 = vld [vmem:[#allocation14 + $0x18] sm:$0xff]  }
0x1083   : > { %3863 = vmatpush3.bf16.msra.mxu0 %v4241_v34 }
0x1084   : > { %3076 = vadd.xlane.f32.xlu0 %v3071_v16  ;;  %3864 = vmatprep.subr.bf16.mxu0 %v4592_v1 }
0x1087   : > { %3865 = vmatpush3.bf16.msra.mxu0 %v4242_v33 }
0x1088   : > { %3866 = vmatprep.subr.bf16.mxu0 %v4592_v1 }
0x108b   : > { %3867 = vmatpush3.bf16.msra.mxu0 %v4243_v25 }
0x108c   : > { %3868 = vmatprep.subr.bf16.mxu0 %v4592_v1 }
0x108f   : > { %3869 = vmatpush3.bf16.msra.mxu0 %v4244_v37 }
0x110d   : > { %v3077_v18 = vpop.xlane.xlu0 %3076 }
0x110e   : > { %v3078_v19 = vmul.f32 0.0078125, %v3077_v18 }
0x1110   : > { %v3079_v20 = vsub.f32 %v3071_v16, %v3078_v19 }
0x1112   : > { %v3080_v21 = vmul.f32 %v3079_v20, %v3079_v20 }
0x1114   : > { %3081 = vadd.xlane.f32.xlu1 %v3080_v21 }
0x119d   : > { %v3082_v26 = vpop.xlane.xlu1 %3081 }
0x119e   : > { %v3083_v30 = vmul.f32 0.0078125, %v3082_v26 }
0x11a0   : > { %v3084_v53 = vadd.f32 1e-12, %v3083_v30 }
0x11a2   : > { %4275 = vrsqrt.f32 %v3084_v53 }
0x11af   : > { %v4276_v29 = vpop.eup %4275 }
0x11b0   : > { %v3086_v27 = vmul.f32 %v4276_v29, %v3079_v20 }
0x11b2   : > { %v3093_v31 = vmul.f32 %v3596_v54, %v3086_v27 }
0x11b4   : > { %v3100_v32 = vadd.f32 %v3597_v28, %v3093_v31 }
0x11b6   : > { %v3101_v1 = vpack.c.bf16 %v3100_v32, %v3100_v32 }
0x11b8   : > { %3871 = vmatmul.mubr.bf16.vlgmr.msra.gmra.mxu0 %v3101_v1 }
0x1278   : > { %v3201_v36 = vpop.f32.mrf.mxu0 }
0x1279   : > { %v3202_v38 = vadd.f32 %v3201_v36, %v3118_v35 }
0x127a   : > { %v3872_v39 = vpop.f32.mrf.mxu0 }
0x127b   : > { %3207 = vst [vmem:[%s656_s16] sm:$0x1] %v3202_v38 }
0x127c   : > { %v3204_v23 = vpop.f32.mrf.mxu0 }
0x127d   : > { %4502 = shalt.err (!%p4499_p11)
}
0x127e   : > { %s4503_s23 = scalar_lea.hbm %s5102_s4, 16  ;;  %s4507_s15 = scalar_lea.hbm %s5214_s3, 32 }
0x127f   : > { %p4504_p12 = scmp.ne.s32.totalorder %s5102_s4, %s4503_s23  ;;  %p4508_p8 = scmp.lt.s32.totalorder %s5102_s4, %s5214_s3 }
0x1280   : > { %p4509_p9 = scmp.lt.s32.totalorder %s4507_s15, %s4503_s23 }
0x1281   : > { %p4505_p0 = pnand %p4504_p12, %p5215_p2 }
0x1282   : > { %p4510_p4 = por %p4509_p9, %p4508_p8 }
0x1283   : > { %p4506_p5 = pneg %p4505_p0 }
0x1285   : > { %p4511_p13 = pnand %p4510_p4, %p4506_p5 }
0x1287   : > { %4514 = shalt.err (!%p4511_p13)
}
0x1288   : > { %3902 = dma.vmem_to_hbm [thread:$0]  (%p5215_p2), %s5104_s18, 16, %s5102_s4, %s3209_s14   ;;  %v3873_v40 = vpop.f32.mrf.mxu0 }
0x1289 PF: > { %s3233_s25 = sand.u32 1, %s4561_s21   ;;  %p5216_p1 = scmp.ne.s32.totalorder %s5198_s20, 0 }
0x128a   : > { %p5217_p6 = scmp.ge.s32.totalorder %s4573_s24, 2  ;;  %s3234_s16 = scalar_lea.sflag [#allocation4], %s3233_s25 }
0x128c   : > { %p3931_p10 = pnand %p5217_p6, %p5216_p1 }
0x128e   : > { %p3932_p7 = pneg %p3931_p10 }
0x1290   : > { %4556 = dma.done.wait (%p3932_p7), %s3234_s16, 16  }
0x1291   : > { %4558 = vsyncadd (%p3932_p7), %s3234_s16, 4294967280  ;;  %s5218_s24 = sld [smem:[#allocation25_spill]]  ;;  %s5221_s21 = smov %s4565_s22 }
0x1292   : > { %s5219_s10 = sld [smem:[#allocation24_spill]] }
0x1293   : > { %s5220_s23 = sld [smem:[#allocation26_spill]] }
0x1297   : > { %p35_p3 = scmp.ge.s32.totalorder %s5218_s24, 4  }
0x1298   : > { %s5222_s22 = smov %s5219_s10 }
0x1299   :  { %37 = sbr.rel (!%p35_p3) target bundleno = 21 (0x15), region = 178 }
0x129e   :  { %3238 = vsyncpa [#allocation3], 1 }
0x129f   :  { %3240 = vsyncpa [#allocation3 + $0x1], 1 }
0x12a0   :  { %3241 = vsyncpa [#allocation6], 1 }
0x12a1   :  { %3243 = vsyncpa [#allocation6 + $0x1], 1 }
0x12a2   :  { %3244 = vsyncpa [#allocation9], 1 }
0x12a3   :  { %3245 = vsyncpa [#allocation12], 1 }
0x12a4   :  { %3246 = vsyncpa [#allocation15], 1 }
0x12a5   :  { %3247 = vsyncpa [#allocation4], 1 }
0x12a6   :  { %3249 = vsyncpa [#allocation4 + $0x1], 1 }

</bundles_post_ra>
